<compile_context>
chip_gen: v7x
topology: tpu7x:2x2x1
jax: 0.10.0
libtpu: 0.0.40
codegen_flags: <defaults>
</compile_context>

<pallas_src>
import jax
import jax.numpy as jnp
import numpy as np
from jax import lax
from jax.experimental import pallas as pl
from jax.experimental.pallas import tpu as pltpu

HP = 128            # per-gate lane-padded slot width (one full vreg lane span)
OP = 128            # lane-padded output width
KP = 8              # sublane-padded contraction dim for the x-projection (input 3 -> 8)
GATE_ORDER = (0, 1, 3, 2)   # PyTorch gate order (i,f,g,o) -> packed slots (i,f,o,g)


def lstm_kernel(x_ref, wih_ref, b_ref,                 # auto-DMA'd VMEM inputs
                whh_hbm, wlin_hbm, blin_hbm,           # pl.ANY (HBM) inputs, manual DMA
                out_ref,                               # VMEM output
                whh_vmem, wlin_vmem, blin_vmem, sem):  # scratch
    """Full LSTM recurrence + final linear in one kernel invocation.

    Shapes:
      x_ref:     (T, KP)  f32   time-major input, batch squeezed, K padded to 8
      wih_ref:   (KP, 4*HP) bf16  input->gate weights, gate slots [i|f|o|g]
      b_ref:     (1, 4*HP) f32   combined b_ih + b_hh, padded lanes zero
      whh_hbm:   (HP, 4*HP) bf16  hidden->gate weights (rows >= H zero), HBM
      wlin_hbm:  (HP, OP)  bf16  final linear weight (padded rows/cols zero), HBM
      blin_hbm:  (1, OP)   f32   final linear bias (padded lanes zero), HBM
      out_ref:   (1, OP)   f32   lane-dense padded output
    """
    T = x_ref.shape[0]
    Hp = whh_vmem.shape[0]          # 128

    # --- kick off weight DMAs; they overlap the hoisted x-projection below ---
    whh_cp = pltpu.make_async_copy(whh_hbm, whh_vmem, sem.at[0])
    wlin_cp = pltpu.make_async_copy(wlin_hbm, wlin_vmem, sem.at[1])
    blin_cp = pltpu.make_async_copy(blin_hbm, blin_vmem, sem.at[2])
    whh_cp.start()
    wlin_cp.start()
    blin_cp.start()

    # --- hoisted input projection: one bf16 MXU pass for all T steps, bias fused,
    #     f32 accumulation ---
    xw = (
        jnp.dot(x_ref[...].astype(jnp.bfloat16), wih_ref[...],
                preferred_element_type=jnp.float32)
        + b_ref[...]
    )                               # (T, 4*Hp) f32

    h = jnp.zeros((1, Hp), jnp.float32)
    c = jnp.zeros((1, Hp), jnp.float32)

    # recurrent weights must be resident before step 0
    whh_cp.wait()

    # --- recurrence: T static -> fully unrolled, static slices everywhere.
    #     whh_vmem[...] is read inside the loop (not hoisted) so the RHS is streamed
    #     from VMEM instead of being pinned in vregs across 8 iterations. ---
    for t in range(T):
        gates = xw[t:t + 1, :] + jnp.dot(
            h.astype(jnp.bfloat16), whh_vmem[...],
            preferred_element_type=jnp.float32)      # (1, 4*Hp) f32

        # two EUP passes per step: sigmoid over the contiguous [i|f|o] span,
        # tanh over the [g] slot. Padded lanes are zero -> sigmoid=0.5, tanh=0,
        # keeping padded lanes of c/h identically zero (inert).
        sig = jax.nn.sigmoid(gates[:, : 3 * Hp])
        g_g = jnp.tanh(gates[:, 3 * Hp:])

        i_g = sig[:, 0 * Hp:1 * Hp]
        f_g = sig[:, 1 * Hp:2 * Hp]
        o_g = sig[:, 2 * Hp:3 * Hp]

        c = f_g * c + i_g * g_g
        h = o_g * jnp.tanh(c)

    # --- final linear; lane-dense (1, OP) unmasked store ---
    wlin_cp.wait()
    blin_cp.wait()
    out_ref[...] = (
        jnp.dot(h.astype(jnp.bfloat16), wlin_vmem[...],
                preferred_element_type=jnp.float32)
        + blin_vmem[...]
    )


def lstm11_forward(x_p, wih_p, b_p, whh_p, wlin_p, blin_p, output_size):
    vmem = pl.BlockSpec(memory_space=pltpu.MemorySpace.VMEM)
    hbm = pl.BlockSpec(memory_space=pl.ANY)
    out = pl.pallas_call(
        lstm_kernel,
        out_shape=jax.ShapeDtypeStruct((1, OP), jnp.float32),
        in_specs=[vmem, vmem, vmem, hbm, hbm, hbm],
        out_specs=vmem,
        scratch_shapes=[
            pltpu.VMEM((HP, 4 * HP), jnp.bfloat16),   # whh
            pltpu.VMEM((HP, OP), jnp.bfloat16),       # wlin
            pltpu.VMEM((1, OP), jnp.float32),         # blin
            pltpu.SemaphoreType.DMA((3,)),
        ],
    )(x_p, wih_p, b_p, whh_p, wlin_p, blin_p)
    return out[0, :output_size]       # (O,) == predictions[-1]


def make_params(key, input_size=3, hidden=30, output=3):
    """Deterministic init mimicking PyTorch's U(-1/sqrt(H), 1/sqrt(H))."""
    k = 1.0 / np.sqrt(hidden)
    keys = jax.random.split(key, 6)
    W_ih = jax.random.uniform(keys[0], (4 * hidden, input_size), jnp.float32, -k, k)
    W_hh = jax.random.uniform(keys[1], (4 * hidden, hidden), jnp.float32, -k, k)
    b_ih = jax.random.uniform(keys[2], (4 * hidden,), jnp.float32, -k, k)
    b_hh = jax.random.uniform(keys[3], (4 * hidden,), jnp.float32, -k, k)
    W_lin = jax.random.uniform(keys[4], (output, hidden), jnp.float32, -k, k)
    b_lin = jax.random.uniform(keys[5], (output,), jnp.float32, -k, k)
    return W_ih, W_hh, b_ih, b_hh, W_lin, b_lin


def pack_params(W_ih, W_hh, b_ih, b_hh, W_lin, b_lin, hidden, input_size, output):
    """Repack PyTorch-layout LSTM/Linear params into the kernel's fused, lane-padded
    layout. Weights are stored bf16 (MXU operands); biases stay f32. Padded weight
    columns / bias lanes are zero so padded gate lanes stay inert."""
    Wih_g = W_ih.reshape(4, hidden, input_size)   # PyTorch gate order i,f,g,o
    Whh_g = W_hh.reshape(4, hidden, hidden)
    b_g = (b_ih + b_hh).reshape(4, hidden)

    wih_p = jnp.zeros((KP, 4 * HP), jnp.float32)
    whh_p = jnp.zeros((HP, 4 * HP), jnp.float32)
    b_p = jnp.zeros((1, 4 * HP), jnp.float32)
    for slot, k in enumerate(GATE_ORDER):         # packed order i,f,o,g
        col = slot * HP
        wih_p = wih_p.at[:input_size, col:col + hidden].set(Wih_g[k].T)
        whh_p = whh_p.at[:hidden, col:col + hidden].set(Whh_g[k].T)
        b_p = b_p.at[0, col:col + hidden].set(b_g[k])

    wlin_p = jnp.zeros((HP, OP), jnp.float32).at[:hidden, :output].set(W_lin.T)
    blin_p = jnp.zeros((1, OP), jnp.float32).at[0, :output].set(b_lin)
    return (wih_p.astype(jnp.bfloat16), b_p,
            whh_p.astype(jnp.bfloat16),
            wlin_p.astype(jnp.bfloat16), blin_p)


def pack_x(x, input_size):
    """Pad the input sequence's contraction dim to KP (sublane-aligned K)."""
    T = x.shape[0]
    return jnp.zeros((T, KP), jnp.float32).at[:, :input_size].set(x)


def ref_forward(x, W_ih, W_hh, b_ih, b_hh, W_lin, b_lin, hidden):
    """Pure-JAX f32 reference of LSTM11.forward (zero initial hidden/cell)."""
    def step(carry, x_t):
        h, c = carry
        gates = x_t @ W_ih.T + b_ih + h @ W_hh.T + b_hh
        i, f, g, o = jnp.split(gates, 4)
        i = jax.nn.sigmoid(i)
        f = jax.nn.sigmoid(f)
        g = jnp.tanh(g)
        o = jax.nn.sigmoid(o)
        c = f * c + i * g
        h = o * jnp.tanh(c)
        return (h, c), h

    (h, _), _ = lax.scan(step, (jnp.zeros(hidden), jnp.zeros(hidden)), x)
    return W_lin @ h + b_lin   # predictions[-1]


def _bf16r(a):
    return a.astype(jnp.bfloat16).astype(jnp.float32)


def ref_forward_mixed(x, W_ih, W_hh, b_ih, b_hh, W_lin, b_lin, hidden):
    """Reference emulating the kernel's mixed precision: bf16 matmul operands,
    f32 accumulation, f32 gates/state. Used for a tight structural check."""
    Wih = _bf16r(W_ih)
    Whh = _bf16r(W_hh)
    Wlin = _bf16r(W_lin)
    b = b_ih + b_hh

    def step(carry, x_t):
        h, c = carry
        gates = _bf16r(x_t) @ Wih.T + b + _bf16r(h) @ Whh.T
        i, f, g, o = jnp.split(gates, 4)
        i = jax.nn.sigmoid(i)
        f = jax.nn.sigmoid(f)
        g = jnp.tanh(g)
        o = jax.nn.sigmoid(o)
        c = f * c + i * g
        h = o * jnp.tanh(c)
        return (h, c), h

    (h, _), _ = lax.scan(step, (jnp.zeros(hidden), jnp.zeros(hidden)), x)
    return Wlin @ _bf16r(h) + b_lin


if __name__ == "__main__":
    INPUT, HIDDEN, OUTPUT, SEQ = 3, 30, 3, 8

    key = jax.random.PRNGKey(0)
    k_x, k_p = jax.random.split(key)
    x = jax.random.normal(k_x, (SEQ, INPUT), jnp.float32)

    W_ih, W_hh, b_ih, b_hh, W_lin, b_lin = make_params(k_p, INPUT, HIDDEN, OUTPUT)
    wih_p, b_p, whh_p, wlin_p, blin_p = pack_params(
        W_ih, W_hh, b_ih, b_hh, W_lin, b_lin, HIDDEN, INPUT, OUTPUT
    )
    x_p = pack_x(x, INPUT)

    # TODO(synk): self.hidden_cell persists across forward() calls in the PyTorch
    # module; here we implement a single stateless forward from the zero state.
    out = lstm11_forward(x_p, wih_p, b_p, whh_p, wlin_p, blin_p, OUTPUT)
    out = jax.block_until_ready(out)

    # Tight check vs a reference that emulates the kernel's bf16-operand / f32-acc
    # mixed precision (validates packing, gate order, recurrence logic).
    ref_m = ref_forward_mixed(x, W_ih, W_hh, b_ih, b_hh, W_lin, b_lin, HIDDEN)
    np.testing.assert_allclose(np.asarray(out), np.asarray(ref_m),
                               rtol=1e-3, atol=1e-3)

    # Semantics check vs the pure-f32 PyTorch-equivalent reference; tolerance covers
    # the bf16 MXU-operand rounding accumulated over 8 recurrent steps.
    ref = ref_forward(x, W_ih, W_hh, b_ih, b_hh, W_lin, b_lin, HIDDEN)
    np.testing.assert_allclose(np.asarray(out), np.asarray(ref),
                               rtol=2e-2, atol=2e-2)

    print("KERNEL_OK")
</pallas_src>

<mosaic_0001>
module attributes {stable_mosaic.version = 11 : i64} {
  func.func @lstm_kernel(%arg0: memref<8x8xf32, #tpu.memory_space<vmem>>, %arg1: memref<8x512xbf16, #tpu.memory_space<vmem>>, %arg2: memref<1x512xf32, #tpu.memory_space<vmem>>, %arg3: memref<128x512xbf16, #tpu.memory_space<any>>, %arg4: memref<128x128xbf16, #tpu.memory_space<any>>, %arg5: memref<1x128xf32, #tpu.memory_space<any>>, %arg6: memref<1x128xf32, #tpu.memory_space<vmem>>, %arg7: memref<128x512xbf16, #tpu.memory_space<vmem>>, %arg8: memref<128x128xbf16, #tpu.memory_space<vmem>>, %arg9: memref<1x128xf32, #tpu.memory_space<vmem>>, %arg10: memref<3x!tpu.dma_semaphore, #tpu.memory_space<semaphore_mem>>) attributes {dimension_semantics = [], scalar_prefetch = 0 : i64, scratch_operands = 4 : i64, tpu.core_type = #tpu.core_type<tc>} {
    %c0_i32 = arith.constant 0 : i32
    %0 = tpu.memref_slice %arg10[%c0_i32] : memref<3x!tpu.dma_semaphore, #tpu.memory_space<semaphore_mem>> -> memref<1x!tpu.dma_semaphore, #tpu.memory_space<semaphore_mem>>
    %1 = tpu.memref_squeeze %0 : memref<1x!tpu.dma_semaphore, #tpu.memory_space<semaphore_mem>> -> memref<!tpu.dma_semaphore, #tpu.memory_space<semaphore_mem>>
    tpu.enqueue_dma source(%arg3 : memref<128x512xbf16, #tpu.memory_space<any>>) target(%arg7 : memref<128x512xbf16, #tpu.memory_space<vmem>>) target_semaphore(%1 : memref<!tpu.dma_semaphore, #tpu.memory_space<semaphore_mem>>)
    %c1_i32 = arith.constant 1 : i32
    %2 = tpu.memref_slice %arg10[%c1_i32] : memref<3x!tpu.dma_semaphore, #tpu.memory_space<semaphore_mem>> -> memref<1x!tpu.dma_semaphore, #tpu.memory_space<semaphore_mem>>
    %3 = tpu.memref_squeeze %2 : memref<1x!tpu.dma_semaphore, #tpu.memory_space<semaphore_mem>> -> memref<!tpu.dma_semaphore, #tpu.memory_space<semaphore_mem>>
    tpu.enqueue_dma source(%arg4 : memref<128x128xbf16, #tpu.memory_space<any>>) target(%arg8 : memref<128x128xbf16, #tpu.memory_space<vmem>>) target_semaphore(%3 : memref<!tpu.dma_semaphore, #tpu.memory_space<semaphore_mem>>)
    %c2_i32 = arith.constant 2 : i32
    %4 = tpu.memref_slice %arg10[%c2_i32] : memref<3x!tpu.dma_semaphore, #tpu.memory_space<semaphore_mem>> -> memref<1x!tpu.dma_semaphore, #tpu.memory_space<semaphore_mem>>
    %5 = tpu.memref_squeeze %4 : memref<1x!tpu.dma_semaphore, #tpu.memory_space<semaphore_mem>> -> memref<!tpu.dma_semaphore, #tpu.memory_space<semaphore_mem>>
    tpu.enqueue_dma source(%arg5 : memref<1x128xf32, #tpu.memory_space<any>>) target(%arg9 : memref<1x128xf32, #tpu.memory_space<vmem>>) target_semaphore(%5 : memref<!tpu.dma_semaphore, #tpu.memory_space<semaphore_mem>>)
    %c0 = arith.constant 0 : index
    %c0_0 = arith.constant 0 : index
    %6 = vector.load %arg0[%c0, %c0_0] : memref<8x8xf32, #tpu.memory_space<vmem>>, vector<8x8xf32>
    %7 = arith.truncf %6 : vector<8x8xf32> to vector<8x8xbf16>
    %c0_1 = arith.constant 0 : index
    %c0_2 = arith.constant 0 : index
    %8 = vector.load %arg1[%c0_1, %c0_2] : memref<8x512xbf16, #tpu.memory_space<vmem>>, vector<8x512xbf16>
    %cst = arith.constant dense<0.000000e+00> : vector<8x512xf32>
    %9 = tpu.matmul %7, %8, %cst {dimension_numbers = #tpu.dot_dimension_numbers<[1], [0], [0], [1], [0, 0, 1, 1], [], []>} : vector<8x8xbf16>, vector<8x512xbf16>, vector<8x512xf32> -> vector<8x512xf32>
    %c0_3 = arith.constant 0 : index
    %c0_4 = arith.constant 0 : index
    %10 = vector.load %arg2[%c0_3, %c0_4] : memref<1x512xf32, #tpu.memory_space<vmem>>, vector<1x512xf32>
    %11 = vector.broadcast %10 : vector<1x512xf32> to vector<8x512xf32>
    %12 = arith.addf %9, %11 : vector<8x512xf32>
    %cst_5 = arith.constant 0.000000e+00 : f32
    %13 = vector.broadcast %cst_5 : f32 to vector<1x128xf32>
    %cst_6 = arith.constant 0.000000e+00 : f32
    %14 = vector.broadcast %cst_6 : f32 to vector<1x128xf32>
    %c0_i32_7 = arith.constant 0 : i32
    %15 = tpu.memref_slice %arg10[%c0_i32_7] : memref<3x!tpu.dma_semaphore, #tpu.memory_space<semaphore_mem>> -> memref<1x!tpu.dma_semaphore, #tpu.memory_space<semaphore_mem>>
    %16 = tpu.memref_squeeze %15 : memref<1x!tpu.dma_semaphore, #tpu.memory_space<semaphore_mem>> -> memref<!tpu.dma_semaphore, #tpu.memory_space<semaphore_mem>>
    tpu.wait_dma2 semaphore(%16 : memref<!tpu.dma_semaphore, #tpu.memory_space<semaphore_mem>>) src(%arg3 : memref<128x512xbf16, #tpu.memory_space<any>>) dst(%arg7 : memref<128x512xbf16, #tpu.memory_space<vmem>>)
    %17 = vector.extract_strided_slice %12 {offsets = [0, 0], sizes = [1, 512], strides = [1, 1]} : vector<8x512xf32> to vector<1x512xf32>
    %18 = arith.truncf %13 : vector<1x128xf32> to vector<1x128xbf16>
    %c0_8 = arith.constant 0 : index
    %c0_9 = arith.constant 0 : index
    %19 = vector.load %arg7[%c0_8, %c0_9] : memref<128x512xbf16, #tpu.memory_space<vmem>>, vector<128x512xbf16>
    %cst_10 = arith.constant dense<0.000000e+00> : vector<1x512xf32>
    %20 = tpu.matmul %18, %19, %cst_10 {dimension_numbers = #tpu.dot_dimension_numbers<[1], [0], [0], [1], [0, 0, 1, 1], [], []>} : vector<1x128xbf16>, vector<128x512xbf16>, vector<1x512xf32> -> vector<1x512xf32>
    %21 = arith.addf %17, %20 : vector<1x512xf32>
    %22 = vector.extract_strided_slice %21 {offsets = [0, 0], sizes = [1, 384], strides = [1, 1]} : vector<1x512xf32> to vector<1x384xf32>
    %23 = arith.negf %22 : vector<1x384xf32>
    %24 = math.exp %23 : vector<1x384xf32>
    %cst_11 = arith.constant 1.000000e+00 : f32
    %25 = vector.broadcast %cst_11 : f32 to vector<1x384xf32>
    %26 = arith.addf %25, %24 : vector<1x384xf32>
    %27 = arith.divf %25, %26 : vector<1x384xf32>
    %28 = vector.extract_strided_slice %21 {offsets = [0, 384], sizes = [1, 128], strides = [1, 1]} : vector<1x512xf32> to vector<1x128xf32>
    %29 = math.tanh %28 : vector<1x128xf32>
    %30 = vector.extract_strided_slice %27 {offsets = [0, 0], sizes = [1, 128], strides = [1, 1]} : vector<1x384xf32> to vector<1x128xf32>
    %31 = vector.extract_strided_slice %27 {offsets = [0, 128], sizes = [1, 128], strides = [1, 1]} : vector<1x384xf32> to vector<1x128xf32>
    %32 = vector.extract_strided_slice %27 {offsets = [0, 256], sizes = [1, 128], strides = [1, 1]} : vector<1x384xf32> to vector<1x128xf32>
    %33 = arith.mulf %31, %14 : vector<1x128xf32>
    %34 = arith.mulf %30, %29 : vector<1x128xf32>
    %35 = arith.addf %33, %34 : vector<1x128xf32>
    %36 = math.tanh %35 : vector<1x128xf32>
    %37 = arith.mulf %32, %36 : vector<1x128xf32>
    %38 = vector.extract_strided_slice %12 {offsets = [1, 0], sizes = [1, 512], strides = [1, 1]} : vector<8x512xf32> to vector<1x512xf32>
    %39 = arith.truncf %37 : vector<1x128xf32> to vector<1x128xbf16>
    %c0_12 = arith.constant 0 : index
    %c0_13 = arith.constant 0 : index
    %40 = vector.load %arg7[%c0_12, %c0_13] : memref<128x512xbf16, #tpu.memory_space<vmem>>, vector<128x512xbf16>
    %cst_14 = arith.constant dense<0.000000e+00> : vector<1x512xf32>
    %41 = tpu.matmul %39, %40, %cst_14 {dimension_numbers = #tpu.dot_dimension_numbers<[1], [0], [0], [1], [0, 0, 1, 1], [], []>} : vector<1x128xbf16>, vector<128x512xbf16>, vector<1x512xf32> -> vector<1x512xf32>
    %42 = arith.addf %38, %41 : vector<1x512xf32>
    %43 = vector.extract_strided_slice %42 {offsets = [0, 0], sizes = [1, 384], strides = [1, 1]} : vector<1x512xf32> to vector<1x384xf32>
    %44 = arith.negf %43 : vector<1x384xf32>
    %45 = math.exp %44 : vector<1x384xf32>
    %cst_15 = arith.constant 1.000000e+00 : f32
    %46 = vector.broadcast %cst_15 : f32 to vector<1x384xf32>
    %47 = arith.addf %46, %45 : vector<1x384xf32>
    %48 = arith.divf %46, %47 : vector<1x384xf32>
    %49 = vector.extract_strided_slice %42 {offsets = [0, 384], sizes = [1, 128], strides = [1, 1]} : vector<1x512xf32> to vector<1x128xf32>
    %50 = math.tanh %49 : vector<1x128xf32>
    %51 = vector.extract_strided_slice %48 {offsets = [0, 0], sizes = [1, 128], strides = [1, 1]} : vector<1x384xf32> to vector<1x128xf32>
    %52 = vector.extract_strided_slice %48 {offsets = [0, 128], sizes = [1, 128], strides = [1, 1]} : vector<1x384xf32> to vector<1x128xf32>
    %53 = vector.extract_strided_slice %48 {offsets = [0, 256], sizes = [1, 128], strides = [1, 1]} : vector<1x384xf32> to vector<1x128xf32>
    %54 = arith.mulf %52, %35 : vector<1x128xf32>
    %55 = arith.mulf %51, %50 : vector<1x128xf32>
    %56 = arith.addf %54, %55 : vector<1x128xf32>
    %57 = math.tanh %56 : vector<1x128xf32>
    %58 = arith.mulf %53, %57 : vector<1x128xf32>
    %59 = vector.extract_strided_slice %12 {offsets = [2, 0], sizes = [1, 512], strides = [1, 1]} : vector<8x512xf32> to vector<1x512xf32>
    %60 = arith.truncf %58 : vector<1x128xf32> to vector<1x128xbf16>
    %c0_16 = arith.constant 0 : index
    %c0_17 = arith.constant 0 : index
    %61 = vector.load %arg7[%c0_16, %c0_17] : memref<128x512xbf16, #tpu.memory_space<vmem>>, vector<128x512xbf16>
    %cst_18 = arith.constant dense<0.000000e+00> : vector<1x512xf32>
    %62 = tpu.matmul %60, %61, %cst_18 {dimension_numbers = #tpu.dot_dimension_numbers<[1], [0], [0], [1], [0, 0, 1, 1], [], []>} : vector<1x128xbf16>, vector<128x512xbf16>, vector<1x512xf32> -> vector<1x512xf32>
    %63 = arith.addf %59, %62 : vector<1x512xf32>
    %64 = vector.extract_strided_slice %63 {offsets = [0, 0], sizes = [1, 384], strides = [1, 1]} : vector<1x512xf32> to vector<1x384xf32>
    %65 = arith.negf %64 : vector<1x384xf32>
    %66 = math.exp %65 : vector<1x384xf32>
    %cst_19 = arith.constant 1.000000e+00 : f32
    %67 = vector.broadcast %cst_19 : f32 to vector<1x384xf32>
    %68 = arith.addf %67, %66 : vector<1x384xf32>
    %69 = arith.divf %67, %68 : vector<1x384xf32>
    %70 = vector.extract_strided_slice %63 {offsets = [0, 384], sizes = [1, 128], strides = [1, 1]} : vector<1x512xf32> to vector<1x128xf32>
    %71 = math.tanh %70 : vector<1x128xf32>
    %72 = vector.extract_strided_slice %69 {offsets = [0, 0], sizes = [1, 128], strides = [1, 1]} : vector<1x384xf32> to vector<1x128xf32>
    %73 = vector.extract_strided_slice %69 {offsets = [0, 128], sizes = [1, 128], strides = [1, 1]} : vector<1x384xf32> to vector<1x128xf32>
    %74 = vector.extract_strided_slice %69 {offsets = [0, 256], sizes = [1, 128], strides = [1, 1]} : vector<1x384xf32> to vector<1x128xf32>
    %75 = arith.mulf %73, %56 : vector<1x128xf32>
    %76 = arith.mulf %72, %71 : vector<1x128xf32>
    %77 = arith.addf %75, %76 : vector<1x128xf32>
    %78 = math.tanh %77 : vector<1x128xf32>
    %79 = arith.mulf %74, %78 : vector<1x128xf32>
    %80 = vector.extract_strided_slice %12 {offsets = [3, 0], sizes = [1, 512], strides = [1, 1]} : vector<8x512xf32> to vector<1x512xf32>
    %81 = arith.truncf %79 : vector<1x128xf32> to vector<1x128xbf16>
    %c0_20 = arith.constant 0 : index
    %c0_21 = arith.constant 0 : index
    %82 = vector.load %arg7[%c0_20, %c0_21] : memref<128x512xbf16, #tpu.memory_space<vmem>>, vector<128x512xbf16>
    %cst_22 = arith.constant dense<0.000000e+00> : vector<1x512xf32>
    %83 = tpu.matmul %81, %82, %cst_22 {dimension_numbers = #tpu.dot_dimension_numbers<[1], [0], [0], [1], [0, 0, 1, 1], [], []>} : vector<1x128xbf16>, vector<128x512xbf16>, vector<1x512xf32> -> vector<1x512xf32>
    %84 = arith.addf %80, %83 : vector<1x512xf32>
    %85 = vector.extract_strided_slice %84 {offsets = [0, 0], sizes = [1, 384], strides = [1, 1]} : vector<1x512xf32> to vector<1x384xf32>
    %86 = arith.negf %85 : vector<1x384xf32>
    %87 = math.exp %86 : vector<1x384xf32>
    %cst_23 = arith.constant 1.000000e+00 : f32
    %88 = vector.broadcast %cst_23 : f32 to vector<1x384xf32>
    %89 = arith.addf %88, %87 : vector<1x384xf32>
    %90 = arith.divf %88, %89 : vector<1x384xf32>
    %91 = vector.extract_strided_slice %84 {offsets = [0, 384], sizes = [1, 128], strides = [1, 1]} : vector<1x512xf32> to vector<1x128xf32>
    %92 = math.tanh %91 : vector<1x128xf32>
    %93 = vector.extract_strided_slice %90 {offsets = [0, 0], sizes = [1, 128], strides = [1, 1]} : vector<1x384xf32> to vector<1x128xf32>
    %94 = vector.extract_strided_slice %90 {offsets = [0, 128], sizes = [1, 128], strides = [1, 1]} : vector<1x384xf32> to vector<1x128xf32>
    %95 = vector.extract_strided_slice %90 {offsets = [0, 256], sizes = [1, 128], strides = [1, 1]} : vector<1x384xf32> to vector<1x128xf32>
    %96 = arith.mulf %94, %77 : vector<1x128xf32>
    %97 = arith.mulf %93, %92 : vector<1x128xf32>
    %98 = arith.addf %96, %97 : vector<1x128xf32>
    %99 = math.tanh %98 : vector<1x128xf32>
    %100 = arith.mulf %95, %99 : vector<1x128xf32>
    %101 = vector.extract_strided_slice %12 {offsets = [4, 0], sizes = [1, 512], strides = [1, 1]} : vector<8x512xf32> to vector<1x512xf32>
    %102 = arith.truncf %100 : vector<1x128xf32> to vector<1x128xbf16>
    %c0_24 = arith.constant 0 : index
    %c0_25 = arith.constant 0 : index
    %103 = vector.load %arg7[%c0_24, %c0_25] : memref<128x512xbf16, #tpu.memory_space<vmem>>, vector<128x512xbf16>
    %cst_26 = arith.constant dense<0.000000e+00> : vector<1x512xf32>
    %104 = tpu.matmul %102, %103, %cst_26 {dimension_numbers = #tpu.dot_dimension_numbers<[1], [0], [0], [1], [0, 0, 1, 1], [], []>} : vector<1x128xbf16>, vector<128x512xbf16>, vector<1x512xf32> -> vector<1x512xf32>
    %105 = arith.addf %101, %104 : vector<1x512xf32>
    %106 = vector.extract_strided_slice %105 {offsets = [0, 0], sizes = [1, 384], strides = [1, 1]} : vector<1x512xf32> to vector<1x384xf32>
    %107 = arith.negf %106 : vector<1x384xf32>
    %108 = math.exp %107 : vector<1x384xf32>
    %cst_27 = arith.constant 1.000000e+00 : f32
    %109 = vector.broadcast %cst_27 : f32 to vector<1x384xf32>
    %110 = arith.addf %109, %108 : vector<1x384xf32>
    %111 = arith.divf %109, %110 : vector<1x384xf32>
    %112 = vector.extract_strided_slice %105 {offsets = [0, 384], sizes = [1, 128], strides = [1, 1]} : vector<1x512xf32> to vector<1x128xf32>
    %113 = math.tanh %112 : vector<1x128xf32>
    %114 = vector.extract_strided_slice %111 {offsets = [0, 0], sizes = [1, 128], strides = [1, 1]} : vector<1x384xf32> to vector<1x128xf32>
    %115 = vector.extract_strided_slice %111 {offsets = [0, 128], sizes = [1, 128], strides = [1, 1]} : vector<1x384xf32> to vector<1x128xf32>
    %116 = vector.extract_strided_slice %111 {offsets = [0, 256], sizes = [1, 128], strides = [1, 1]} : vector<1x384xf32> to vector<1x128xf32>
    %117 = arith.mulf %115, %98 : vector<1x128xf32>
    %118 = arith.mulf %114, %113 : vector<1x128xf32>
    %119 = arith.addf %117, %118 : vector<1x128xf32>
    %120 = math.tanh %119 : vector<1x128xf32>
    %121 = arith.mulf %116, %120 : vector<1x128xf32>
    %122 = vector.extract_strided_slice %12 {offsets = [5, 0], sizes = [1, 512], strides = [1, 1]} : vector<8x512xf32> to vector<1x512xf32>
    %123 = arith.truncf %121 : vector<1x128xf32> to vector<1x128xbf16>
    %c0_28 = arith.constant 0 : index
    %c0_29 = arith.constant 0 : index
    %124 = vector.load %arg7[%c0_28, %c0_29] : memref<128x512xbf16, #tpu.memory_space<vmem>>, vector<128x512xbf16>
    %cst_30 = arith.constant dense<0.000000e+00> : vector<1x512xf32>
    %125 = tpu.matmul %123, %124, %cst_30 {dimension_numbers = #tpu.dot_dimension_numbers<[1], [0], [0], [1], [0, 0, 1, 1], [], []>} : vector<1x128xbf16>, vector<128x512xbf16>, vector<1x512xf32> -> vector<1x512xf32>
    %126 = arith.addf %122, %125 : vector<1x512xf32>
    %127 = vector.extract_strided_slice %126 {offsets = [0, 0], sizes = [1, 384], strides = [1, 1]} : vector<1x512xf32> to vector<1x384xf32>
    %128 = arith.negf %127 : vector<1x384xf32>
    %129 = math.exp %128 : vector<1x384xf32>
    %cst_31 = arith.constant 1.000000e+00 : f32
    %130 = vector.broadcast %cst_31 : f32 to vector<1x384xf32>
    %131 = arith.addf %130, %129 : vector<1x384xf32>
    %132 = arith.divf %130, %131 : vector<1x384xf32>
    %133 = vector.extract_strided_slice %126 {offsets = [0, 384], sizes = [1, 128], strides = [1, 1]} : vector<1x512xf32> to vector<1x128xf32>
    %134 = math.tanh %133 : vector<1x128xf32>
    %135 = vector.extract_strided_slice %132 {offsets = [0, 0], sizes = [1, 128], strides = [1, 1]} : vector<1x384xf32> to vector<1x128xf32>
    %136 = vector.extract_strided_slice %132 {offsets = [0, 128], sizes = [1, 128], strides = [1, 1]} : vector<1x384xf32> to vector<1x128xf32>
    %137 = vector.extract_strided_slice %132 {offsets = [0, 256], sizes = [1, 128], strides = [1, 1]} : vector<1x384xf32> to vector<1x128xf32>
    %138 = arith.mulf %136, %119 : vector<1x128xf32>
    %139 = arith.mulf %135, %134 : vector<1x128xf32>
    %140 = arith.addf %138, %139 : vector<1x128xf32>
    %141 = math.tanh %140 : vector<1x128xf32>
    %142 = arith.mulf %137, %141 : vector<1x128xf32>
    %143 = vector.extract_strided_slice %12 {offsets = [6, 0], sizes = [1, 512], strides = [1, 1]} : vector<8x512xf32> to vector<1x512xf32>
    %144 = arith.truncf %142 : vector<1x128xf32> to vector<1x128xbf16>
    %c0_32 = arith.constant 0 : index
    %c0_33 = arith.constant 0 : index
    %145 = vector.load %arg7[%c0_32, %c0_33] : memref<128x512xbf16, #tpu.memory_space<vmem>>, vector<128x512xbf16>
    %cst_34 = arith.constant dense<0.000000e+00> : vector<1x512xf32>
    %146 = tpu.matmul %144, %145, %cst_34 {dimension_numbers = #tpu.dot_dimension_numbers<[1], [0], [0], [1], [0, 0, 1, 1], [], []>} : vector<1x128xbf16>, vector<128x512xbf16>, vector<1x512xf32> -> vector<1x512xf32>
    %147 = arith.addf %143, %146 : vector<1x512xf32>
    %148 = vector.extract_strided_slice %147 {offsets = [0, 0], sizes = [1, 384], strides = [1, 1]} : vector<1x512xf32> to vector<1x384xf32>
    %149 = arith.negf %148 : vector<1x384xf32>
    %150 = math.exp %149 : vector<1x384xf32>
    %cst_35 = arith.constant 1.000000e+00 : f32
    %151 = vector.broadcast %cst_35 : f32 to vector<1x384xf32>
    %152 = arith.addf %151, %150 : vector<1x384xf32>
    %153 = arith.divf %151, %152 : vector<1x384xf32>
    %154 = vector.extract_strided_slice %147 {offsets = [0, 384], sizes = [1, 128], strides = [1, 1]} : vector<1x512xf32> to vector<1x128xf32>
    %155 = math.tanh %154 : vector<1x128xf32>
    %156 = vector.extract_strided_slice %153 {offsets = [0, 0], sizes = [1, 128], strides = [1, 1]} : vector<1x384xf32> to vector<1x128xf32>
    %157 = vector.extract_strided_slice %153 {offsets = [0, 128], sizes = [1, 128], strides = [1, 1]} : vector<1x384xf32> to vector<1x128xf32>
    %158 = vector.extract_strided_slice %153 {offsets = [0, 256], sizes = [1, 128], strides = [1, 1]} : vector<1x384xf32> to vector<1x128xf32>
    %159 = arith.mulf %157, %140 : vector<1x128xf32>
    %160 = arith.mulf %156, %155 : vector<1x128xf32>
    %161 = arith.addf %159, %160 : vector<1x128xf32>
    %162 = math.tanh %161 : vector<1x128xf32>
    %163 = arith.mulf %158, %162 : vector<1x128xf32>
    %164 = vector.extract_strided_slice %12 {offsets = [7, 0], sizes = [1, 512], strides = [1, 1]} : vector<8x512xf32> to vector<1x512xf32>
    %165 = arith.truncf %163 : vector<1x128xf32> to vector<1x128xbf16>
    %c0_36 = arith.constant 0 : index
    %c0_37 = arith.constant 0 : index
    %166 = vector.load %arg7[%c0_36, %c0_37] : memref<128x512xbf16, #tpu.memory_space<vmem>>, vector<128x512xbf16>
    %cst_38 = arith.constant dense<0.000000e+00> : vector<1x512xf32>
    %167 = tpu.matmul %165, %166, %cst_38 {dimension_numbers = #tpu.dot_dimension_numbers<[1], [0], [0], [1], [0, 0, 1, 1], [], []>} : vector<1x128xbf16>, vector<128x512xbf16>, vector<1x512xf32> -> vector<1x512xf32>
    %168 = arith.addf %164, %167 : vector<1x512xf32>
    %169 = vector.extract_strided_slice %168 {offsets = [0, 0], sizes = [1, 384], strides = [1, 1]} : vector<1x512xf32> to vector<1x384xf32>
    %170 = arith.negf %169 : vector<1x384xf32>
    %171 = math.exp %170 : vector<1x384xf32>
    %cst_39 = arith.constant 1.000000e+00 : f32
    %172 = vector.broadcast %cst_39 : f32 to vector<1x384xf32>
    %173 = arith.addf %172, %171 : vector<1x384xf32>
    %174 = arith.divf %172, %173 : vector<1x384xf32>
    %175 = vector.extract_strided_slice %168 {offsets = [0, 384], sizes = [1, 128], strides = [1, 1]} : vector<1x512xf32> to vector<1x128xf32>
    %176 = math.tanh %175 : vector<1x128xf32>
    %177 = vector.extract_strided_slice %174 {offsets = [0, 0], sizes = [1, 128], strides = [1, 1]} : vector<1x384xf32> to vector<1x128xf32>
    %178 = vector.extract_strided_slice %174 {offsets = [0, 128], sizes = [1, 128], strides = [1, 1]} : vector<1x384xf32> to vector<1x128xf32>
    %179 = vector.extract_strided_slice %174 {offsets = [0, 256], sizes = [1, 128], strides = [1, 1]} : vector<1x384xf32> to vector<1x128xf32>
    %180 = arith.mulf %178, %161 : vector<1x128xf32>
    %181 = arith.mulf %177, %176 : vector<1x128xf32>
    %182 = arith.addf %180, %181 : vector<1x128xf32>
    %183 = math.tanh %182 : vector<1x128xf32>
    %184 = arith.mulf %179, %183 : vector<1x128xf32>
    %c1_i32_40 = arith.constant 1 : i32
    %185 = tpu.memref_slice %arg10[%c1_i32_40] : memref<3x!tpu.dma_semaphore, #tpu.memory_space<semaphore_mem>> -> memref<1x!tpu.dma_semaphore, #tpu.memory_space<semaphore_mem>>
    %186 = tpu.memref_squeeze %185 : memref<1x!tpu.dma_semaphore, #tpu.memory_space<semaphore_mem>> -> memref<!tpu.dma_semaphore, #tpu.memory_space<semaphore_mem>>
    tpu.wait_dma2 semaphore(%186 : memref<!tpu.dma_semaphore, #tpu.memory_space<semaphore_mem>>) src(%arg4 : memref<128x128xbf16, #tpu.memory_space<any>>) dst(%arg8 : memref<128x128xbf16, #tpu.memory_space<vmem>>)
    %c2_i32_41 = arith.constant 2 : i32
    %187 = tpu.memref_slice %arg10[%c2_i32_41] : memref<3x!tpu.dma_semaphore, #tpu.memory_space<semaphore_mem>> -> memref<1x!tpu.dma_semaphore, #tpu.memory_space<semaphore_mem>>
    %188 = tpu.memref_squeeze %187 : memref<1x!tpu.dma_semaphore, #tpu.memory_space<semaphore_mem>> -> memref<!tpu.dma_semaphore, #tpu.memory_space<semaphore_mem>>
    tpu.wait_dma2 semaphore(%188 : memref<!tpu.dma_semaphore, #tpu.memory_space<semaphore_mem>>) src(%arg5 : memref<1x128xf32, #tpu.memory_space<any>>) dst(%arg9 : memref<1x128xf32, #tpu.memory_space<vmem>>)
    %189 = arith.truncf %184 : vector<1x128xf32> to vector<1x128xbf16>
    %c0_42 = arith.constant 0 : index
    %c0_43 = arith.constant 0 : index
    %190 = vector.load %arg8[%c0_42, %c0_43] : memref<128x128xbf16, #tpu.memory_space<vmem>>, vector<128x128xbf16>
    %cst_44 = arith.constant dense<0.000000e+00> : vector<1x128xf32>
    %191 = tpu.matmul %189, %190, %cst_44 {dimension_numbers = #tpu.dot_dimension_numbers<[1], [0], [0], [1], [0, 0, 1, 1], [], []>} : vector<1x128xbf16>, vector<128x128xbf16>, vector<1x128xf32> -> vector<1x128xf32>
    %c0_45 = arith.constant 0 : index
    %c0_46 = arith.constant 0 : index
    %192 = vector.load %arg9[%c0_45, %c0_46] : memref<1x128xf32, #tpu.memory_space<vmem>>, vector<1x128xf32>
    %193 = arith.addf %191, %192 : vector<1x128xf32>
    %c0_47 = arith.constant 0 : index
    %c0_48 = arith.constant 0 : index
    %194 = vector.load %arg6[%c0_47, %c0_48] : memref<1x128xf32, #tpu.memory_space<vmem>>, vector<1x128xf32>
    tpu.vector_store %arg6[%c0_47, %c0_48], %193 {strides = array<i32>} : memref<1x128xf32, #tpu.memory_space<vmem>>, vector<1x128xf32>,
    return
  }
}

</mosaic_0001>

<bundles_post_ra>
// kernel: tpu_custom_call.1
= control target key start
LH: loop header
LB: loop body
LE: loop exit
PB: predicated region body
PF: predicated region fallthrough
CT: control target
= control target key end

     0   :  { %11 = vsyncpa [#allocation7], 0  ;;  %s2255_s0 = inlined_call_operand.hbm [shape: f32[8,8], index: 0, kind: input, shape index: {}]   ;;  %s2256_s1 = inlined_call_operand.hbm [shape: bf16[8,512], index: 1, kind: input, shape index: {}]   ;;  %s2257_s2 = inlined_call_operand.vmem [shape: f32[1,512], index: 2, kind: input, shape index: {}]   ;;  %s2258_s3 = inlined_call_operand.hbm [shape: bf16[128,512], index: 3, kind: input, shape index: {}]   ;;  %s2259_s4 = inlined_call_operand.hbm [shape: bf16[128,128], index: 4, kind: input, shape index: {}]   ;;  %s2260_s5 = inlined_call_operand.vmem [shape: f32[1,128], index: 5, kind: input, shape index: {}]   ;;  %s2261_s6 = inlined_call_operand.hbm [shape: f32[1,128], index: 6, kind: output, shape index: {}]  }
   0x1   :  { %12 = vsyncpa [#allocation10], 0 }
   0x2   :  { %13 = vsyncpa [#allocation8], 0  ;;  %s1773_s21 = smov [#allocation6]   ;;  %s1774_s23 = smov [#allocation9]  }
   0x3   :  { %s20_s22 = sshll.u32 %s1773_s21, 4  ;;  %s30_s24 = sshll.u32 %s1774_s23, 4  ;;  %s21_s22 = int_to_ptr.vmem [resolvable:$true] %s20_s22  ;;  %s31_s24 = int_to_ptr.vmem [resolvable:$true] %s30_s24 }
   0x4   :  { %s1673_s27 = scalar_lea.hbm %s2255_s0, 128 }
   0x5   :  { %p1674_p0 = scmp.ne.s32.totalorder %s2255_s0, %s1673_s27  ;;  %p1677_p1 = scmp.lt.u32.totalorder %s1673_s27, %s2255_s0 }
   0x7   :  { %p1679_p2 = pnand %p1677_p1, %p1674_p0 }
   0x9   :  { %1682 = shalt.err (!%p1679_p2)
}
   0xa   :  { %s1683_s8 = scalar_lea.vmem %s21_s22, 128  ;;  %p1688_p4 = scmp.lt.s32.totalorder %s21_s22, %s21_s22 }
   0xb   :  { %p1684_p3 = scmp.ne.s32.totalorder %s21_s22, %s1683_s8  ;;  %p1689_p5 = scmp.lt.s32.totalorder %s1683_s8, %s1683_s8 }
   0xd   :  { %p1690_p6 = por %p1689_p5, %p1688_p4 }
   0xf   :  { %p1691_p7 = pnand %p1690_p6, %p1684_p3 }
  0x11   :  { %1694 = shalt.err (!%p1691_p7)
}
  0x12   :  { %23 = dma.hbm_to_vmem [thread:$0]  %s2255_s0, 128, %s21_s22, [#allocation7]  }
  0x13   :  { %s1695_s13 = scalar_lea.hbm %s2256_s1, 256 }
  0x14   :  { %p1696_p8 = scmp.ne.s32.totalorder %s2256_s1, %s1695_s13  ;;  %p1699_p9 = scmp.lt.u32.totalorder %s1695_s13, %s2256_s1 }
  0x16   :  { %p1701_p10 = pnand %p1699_p9, %p1696_p8 }
  0x18   :  { %1704 = shalt.err (!%p1701_p10)
}
  0x19   :  { %s1705_s18 = scalar_lea.vmem %s31_s24, 256  ;;  %p1710_p12 = scmp.lt.s32.totalorder %s31_s24, %s31_s24 }
  0x1a   :  { %p1706_p11 = scmp.ne.s32.totalorder %s31_s24, %s1705_s18  ;;  %p1711_p13 = scmp.lt.s32.totalorder %s1705_s18, %s1705_s18 }
  0x1c   :  { %p1712_p0 = por %p1711_p13, %p1710_p12 }
  0x1e   :  { %p1713_p1 = pnand %p1712_p0, %p1706_p11 }
  0x20   :  { %1716 = shalt.err (!%p1713_p1)
}
  0x21   :  { %33 = dma.hbm_to_vmem [thread:$0]  %s2256_s1, 256, %s31_s24, [#allocation10]  }
  0x22   :  { %1761 = dma.done.wait [#allocation7], 128  }
  0x23   :  { %1762 = vsyncadd [#allocation7], 4294967168 }
  0x24   :  { %1763 = dma.done.wait [#allocation10], 256  }
  0x25   :  { %1764 = vsyncadd [#allocation10], 4294967040  ;;  %s47_s20 = sld [smem:[#allocation0]]   ;;  %s1775_s21 = smov 512  }
  0x26   :  { %59 = sst [smem:[#allocation13]] %s1775_s21  ;;  %s1776_s22 = smov 4  }
  0x27   :  { %61 = sst [smem:[#allocation13 + $0x1]] %s1775_s21  ;;  %s1777_s23 = smov 64  }
  0x28   :  { %63 = sst [smem:[#allocation13 + $0x2]] %s1776_s22  ;;  %s1778_s25 = smov 128  }
  0x29   :  { %65 = sst [smem:[#allocation13 + $0x3]] %s1777_s23  ;;  %s1779_s26 = smov 2  }
  0x2a   :  { %67 = sst [smem:[#allocation13 + $0x4]] %s1778_s25  ;;  %s1780_s28 = smov 256  }
  0x2b   :  { %69 = sst [smem:[#allocation13 + $0x5]] %s1779_s26  ;;  %s1429_s27 = sshll.u32 %s47_s20, 26 }
  0x2c   :  { %71 = sst [smem:[#allocation13 + $0x6]] %s1780_s28  ;;  %s1430_s1 = sadd.s32 134217728, %s1429_s27 }
  0x2d   :  { %73 = sst [smem:[#allocation13 + $0x7]] %s1777_s23  ;;  %s1781_s24 = smov [#allocation2]  }
  0x2e   :  { %75 = sst [smem:[#allocation13 + $0x8]] %s1776_s22  ;;  %s55_s29 = sshll.u32 %s1781_s24, 4  ;;  %s56_s29 = int_to_ptr.vmem [resolvable:$true] %s55_s29 }
  0x2f   :  { %s1782_s30 = smov [#allocation5]   ;;  %s1783_s7 = smov [#allocation12]  }
  0x30   :  { %77 = dma.general %s2258_s3, 4096, %s56_s29, %s1782_s30, %s1783_s7, [#allocation13], %s1430_s1, 0  }
  0x31   :  { %s1784_s10 = smov [#allocation3]   ;;  %s1717_s14 = scalar_lea.hbm %s2259_s4, 1024 }
  0x32   :  { %s86_s11 = sshll.u32 %s1784_s10, 4  ;;  %p1718_p2 = scmp.ne.s32.totalorder %s2259_s4, %s1717_s14  ;;  %s87_s11 = int_to_ptr.vmem [resolvable:$true] %s86_s11 }
  0x33   :  { %p1721_p3 = scmp.lt.u32.totalorder %s1717_s14, %s2259_s4 }
  0x35   :  { %p1723_p4 = pnand %p1721_p3, %p1718_p2 }
  0x37   :  { %1726 = shalt.err (!%p1723_p4)  }
  0x38   :  { %s1727_s0 = scalar_lea.vmem %s87_s11, 1024  ;;  %p1732_p6 = scmp.lt.s32.totalorder %s87_s11, %s87_s11 }
  0x39   :  { %p1728_p5 = scmp.ne.s32.totalorder %s87_s11, %s1727_s0  ;;  %p1733_p7 = scmp.lt.s32.totalorder %s1727_s0, %s1727_s0 }
  0x3b   :  { %p1734_p8 = por %p1733_p7, %p1732_p6 }
  0x3d   :  { %p1735_p9 = pnand %p1734_p8, %p1728_p5 }
  0x3f   :  { %1738 = shalt.err (!%p1735_p9)  }
  0x40   :  { %89 = dma.hbm_to_vmem [thread:$0]  %s2259_s4, 1024, %s87_s11, [#allocation5 + $0x1]  ;;  %v108_v0 = vld [vmem:[%s2260_s5] sm:$0x1] }
  0x41   :  { %109 = vst [vmem:[#allocation4] sm:$0x1] %v108_v0 }
  0x42   :  { %134 = vsyncadd [#allocation5 + $0x2], 16  ;;  %v137_v1 = vld [vmem:[#allocation9] sm:$0xff]  ;;  %vm175_vm0 = vcmask 1043456   ;;  %v135_v2 = vld [vmem:[#allocation6] sm:$0xff]  ;;  %v1785_v5 = vmov 0   ;;  %v141_v12 = vlaneseq }
  0x43   :  { %v1432_v3 = vcombine.high %v137_v1, %v137_v1  ;;  %v1431_v4 = vcombine.low %v137_v1, %v137_v1  ;;  %220 = vmatprep.mubr.bf16.mxu1 %v1785_v5  ;;  %v138_v6 = vld [vmem:[#allocation9 + $0x8] sm:$0xff]  ;;  %v136_v10 = vpack.c.bf16 %v135_v2, %v135_v2  ;;  %vm171_vm1 = vcmask 64512   ;;  %v139_v15 = vld [vmem:[%s2257_s2] sm:$0xf] }
  0x44   :  { %v1434_v7 = vcombine.high %v138_v6, %v138_v6  ;;  %v1433_v8 = vcombine.low %v138_v6, %v138_v6  ;;  %v142_v13 = vshrl.u32 %v141_v12, 7 }
  0x45   :  { %1435 = vmatprep.subr.msk.bf16.mxu1 %vm175_vm0, %v1432_v3  ;;  %v177_v9 = vsel %vm175_vm0, %v1431_v4, 0 }
  0x46   :  { %189 = vmatpush1.bf16.msra.mxu1 %v177_v9  ;;  %v183_v11 = vsel %vm175_vm0, %v1433_v8, 0  ;;  %v143_v14 = vsub.s32 0, %v142_v13  ;;  %v147_v16 = vsub.s32 1, %v142_v13  ;;  %v151_v22 = vsub.s32 2, %v142_v13 }
  0x47   :  { %1437 = vmatprep.subr.msk.bf16.mxu1 %vm175_vm0, %v1434_v7  ;;  %v155_v25 = vsub.s32 3, %v142_v13 }
  0x48   :  { %v144_v17 = vrot.slane %v139_v15, %v143_v14  ;;  %v148_v18 = vrot.slane %v139_v15, %v147_v16  ;;  %v152_v27 = vrot.slane %v139_v15, %v151_v22 }
  0x49   :  { %1436 = vmatmul.mubr.msk.bf16.vlgmr.msra.gmra.mrb[0].mxu1 %vm171_vm1, %v136_v10  ;;  %v156_v28 = vrot.slane %v139_v15, %v155_v25 }
  0x4a   :  { %230 = vmatpush1.bf16.msra.mxu1 %v183_v11  ;;  %261 = vmatprep.mubr.bf16.mxu1 %v1785_v5 }
  0x51   :  { %1438 = vmatmul.mubr.msk.bf16.vlgmr.msra.gmra.mrb[4].mxu1 %vm171_vm1, %v136_v10 }
 0x11c   :  { %v222_v19 = vpop.f32.mrb[0].mxu1 }
 0x11d   :  { %v1871_v20 = vadd.f32 %v222_v19, %v144_v17  ;;  %v224_v21 = vpop.f32.mrb[1].mxu1 }
 0x11e   :  { %v1873_v23 = vadd.f32 %v224_v21, %v148_v18  ;;  %v226_v24 = vpop.f32.mrb[2].mxu1 }
 0x11f   :  { %v227_v26 = vpop.f32.mrb[3].mxu1 }
 0x124   :  { %v263_v29 = vpop.f32.mrb[4].mxu1 }
 0x125   :  { %v1875_v30 = vadd.f32 %v263_v29, %v152_v27  ;;  %v265_v31 = vpop.f32.mrb[5].mxu1 }
 0x126   :  { %v1877_v32 = vadd.f32 %v265_v31, %v156_v28  ;;  %v267_v33 = vpop.f32.mrb[6].mxu1 }
 0x127   :  { %v268_v34 = vpop.f32.mrb[7].mxu1 }
 0x128   :  { %1765 = dma.done.wait [#allocation5], 4096 }
 0x129   :  { %1766 = vsyncadd [#allocation5], 4294963200  ;;  %338 = vmatprep.mubr.bf16.mxu0 %v1785_v5  ;;  %379 = vmatprep.mubr.bf16.mxu1 %v1785_v5  ;;  %v1881_v35 = vld [vmem:[#allocation2 + $0x8] sm:$0xff]  ;;  %v1883_v36 = vld [vmem:[#allocation2] sm:$0xff] }
 0x12a   :  { %v1885_v37 = vld [vmem:[#allocation2 + $0x28] sm:$0xff]  ;;  %306 = vmatprep.subr.bf16.mxu0 %v1881_v35  ;;  %v1889_v38 = vld [vmem:[#allocation2 + $0x18] sm:$0xff]  ;;  %v1892_v39 = vld [vmem:[#allocation2 + $0x20] sm:$0xff] }
 0x12b   :  { %307 = vmatpush1.bf16.msra.mxu0 %v1883_v36  ;;  %347 = vmatprep.subr.bf16.mxu1 %v1889_v38  ;;  %v1895_v40 = vld [vmem:[#allocation2 + $0x10] sm:$0xff]  ;;  %v1897_v41 = vld [vmem:[#allocation2 + $0x38] sm:$0xff]  ;;  %v1899_v42 = vld [vmem:[#allocation2 + $0x48] sm:$0xff] }
 0x12c   :  { %308 = vmatprep.subr.bf16.mxu0 %v1885_v37  ;;  %348 = vmatpush1.bf16.msra.mxu1 %v1895_v40  ;;  %v1903_v43 = vld [vmem:[#allocation2 + $0x30] sm:$0xff]  ;;  %v1906_v44 = vld [vmem:[#allocation2 + $0x58] sm:$0xff]  ;;  %v1909_v45 = vld [vmem:[#allocation2 + $0x40] sm:$0xff] }
 0x12d   :  { %349 = vmatprep.subr.bf16.mxu1 %v1897_v41  ;;  %v1911_v46 = vld [vmem:[#allocation2 + $0x68] sm:$0xff]  ;;  %v1915_v47 = vld [vmem:[#allocation2 + $0x50] sm:$0xff]  ;;  %v1918_v48 = vld [vmem:[#allocation2 + $0x78] sm:$0xff] }
 0x12e   :  { %v1921_v49 = vld [vmem:[#allocation2 + $0x60] sm:$0xff]  ;;  %v1923_v50 = vld [vmem:[#allocation2 + $0x88] sm:$0xff]  ;;  %v1927_v51 = vld [vmem:[#allocation2 + $0x70] sm:$0xff] }
 0x12f   :  { %309 = vmatpush1.bf16.msra.mxu0 %v1892_v39  ;;  %v1930_v52 = vld [vmem:[#allocation2 + $0x98] sm:$0xff]  ;;  %v1933_v53 = vld [vmem:[#allocation2 + $0x80] sm:$0xff]  ;;  %v1935_v54 = vld [vmem:[#allocation2 + $0xa8] sm:$0xff] }
 0x130   :  { %310 = vmatprep.subr.bf16.mxu0 %v1899_v42  ;;  %350 = vmatpush1.bf16.msra.mxu1 %v1903_v43  ;;  %v1939_v55 = vld [vmem:[#allocation2 + $0x90] sm:$0xff]  ;;  %v1942_v56 = vld [vmem:[#allocation2 + $0xb8] sm:$0xff]  ;;  %v1945_v57 = vld [vmem:[#allocation2 + $0xa0] sm:$0xff] }
 0x131   :  { %351 = vmatprep.subr.bf16.mxu1 %v1906_v44  ;;  %v1947_v58 = vld [vmem:[#allocation2 + $0xc8] sm:$0xff]  ;;  %v1951_v59 = vld [vmem:[#allocation2 + $0xb0] sm:$0xff]  ;;  %v1954_v60 = vld [vmem:[#allocation2 + $0xd8] sm:$0xff] }
 0x132   :  { %v1957_v61 = vld [vmem:[#allocation2 + $0xc0] sm:$0xff]  ;;  %v1959_v62 = vld [vmem:[#allocation2 + $0xe8] sm:$0xff]  ;;  %v1963_v63 = vld [vmem:[#allocation2 + $0xd0] sm:$0xff] }
 0x133   :  { %311 = vmatpush1.bf16.msra.mxu0 %v1909_v45  ;;  %v1966_v0 = vld [vmem:[#allocation2 + $0xf8] sm:$0xff]  ;;  %v1969_v1 = vld [vmem:[#allocation2 + $0xe0] sm:$0xff]  ;;  %v1973_v2 = vld [vmem:[#allocation2 + $0xf0] sm:$0xff] }
 0x134   :  { %312 = vmatprep.subr.bf16.mxu0 %v1911_v46  ;;  %352 = vmatpush1.bf16.msra.mxu1 %v1915_v47 }
 0x135   :  { %353 = vmatprep.subr.bf16.mxu1 %v1918_v48 }
 0x137   :  { %313 = vmatpush1.bf16.msra.mxu0 %v1921_v49 }
 0x138   :  { %314 = vmatprep.subr.bf16.mxu0 %v1923_v50  ;;  %354 = vmatpush1.bf16.msra.mxu1 %v1927_v51 }
 0x139   :  { %355 = vmatprep.subr.bf16.mxu1 %v1930_v52 }
 0x13b   :  { %315 = vmatpush1.bf16.msra.mxu0 %v1933_v53 }
 0x13c   :  { %316 = vmatprep.subr.bf16.mxu0 %v1935_v54  ;;  %356 = vmatpush1.bf16.msra.mxu1 %v1939_v55 }
 0x13d   :  { %357 = vmatprep.subr.bf16.mxu1 %v1942_v56 }
 0x13f   :  { %317 = vmatpush1.bf16.msra.mxu0 %v1945_v57 }
 0x140   :  { %318 = vmatprep.subr.bf16.mxu0 %v1947_v58  ;;  %358 = vmatpush1.bf16.msra.mxu1 %v1951_v59 }
 0x141   :  { %359 = vmatprep.subr.bf16.mxu1 %v1954_v60 }
 0x143   :  { %319 = vmatpush1.bf16.msra.mxu0 %v1957_v61 }
 0x144   :  { %320 = vmatprep.subr.bf16.mxu0 %v1959_v62  ;;  %360 = vmatpush1.bf16.msra.mxu1 %v1963_v63 }
 0x145   :  { %361 = vmatprep.subr.bf16.mxu1 %v1966_v0 }
 0x147   :  { %321 = vmatpush1.bf16.msra.mxu0 %v1969_v1 }
 0x148   :  { %417 = vmatprep.subr.bf16.mxu0 %v1881_v35  ;;  %362 = vmatpush1.bf16.msra.mxu1 %v1973_v2 }
 0x149   :  { %458 = vmatprep.subr.bf16.mxu1 %v1889_v38 }
 0x14a   :  { %339 = vmatmul.mubr.bf16.vlgmr.msra.gmra.mrb[0].mxu0 %v1785_v5 }
 0x14b   :  { %418 = vmatpush1.bf16.msra.mxu0 %v1883_v36  ;;  %449 = vmatprep.mubr.bf16.mxu0 %v1785_v5 }
 0x14c   :  { %380 = vmatmul.mubr.bf16.vlgmr.msra.gmra.mrb[8].mxu1 %v1785_v5  ;;  %419 = vmatprep.subr.bf16.mxu0 %v1885_v37 }
 0x14d   :  { %459 = vmatpush1.bf16.msra.mxu1 %v1895_v40  ;;  %490 = vmatprep.mubr.bf16.mxu1 %v1785_v5 }
 0x14e   :  { %460 = vmatprep.subr.bf16.mxu1 %v1897_v41 }
 0x14f   :  { %420 = vmatpush1.bf16.msra.mxu0 %v1892_v39 }
 0x150   :  { %421 = vmatprep.subr.bf16.mxu0 %v1899_v42 }
 0x151   :  { %461 = vmatpush1.bf16.msra.mxu1 %v1903_v43 }
 0x152   :  { %462 = vmatprep.subr.bf16.mxu1 %v1906_v44 }
 0x153   :  { %422 = vmatpush1.bf16.msra.mxu0 %v1909_v45 }
 0x154   :  { %423 = vmatprep.subr.bf16.mxu0 %v1911_v46 }
 0x155   :  { %463 = vmatpush1.bf16.msra.mxu1 %v1915_v47 }
 0x156   :  { %464 = vmatprep.subr.bf16.mxu1 %v1918_v48 }
 0x157   :  { %424 = vmatpush1.bf16.msra.mxu0 %v1921_v49 }
 0x158   :  { %425 = vmatprep.subr.bf16.mxu0 %v1923_v50 }
 0x159   :  { %465 = vmatpush1.bf16.msra.mxu1 %v1927_v51 }
 0x15a   :  { %466 = vmatprep.subr.bf16.mxu1 %v1930_v52 }
 0x15b   :  { %426 = vmatpush1.bf16.msra.mxu0 %v1933_v53 }
 0x15c   :  { %427 = vmatprep.subr.bf16.mxu0 %v1935_v54 }
 0x15d   :  { %467 = vmatpush1.bf16.msra.mxu1 %v1939_v55 }
 0x15e   :  { %468 = vmatprep.subr.bf16.mxu1 %v1942_v56 }
 0x15f   :  { %428 = vmatpush1.bf16.msra.mxu0 %v1945_v57 }
 0x160   :  { %429 = vmatprep.subr.bf16.mxu0 %v1947_v58 }
 0x161   :  { %469 = vmatpush1.bf16.msra.mxu1 %v1951_v59 }
 0x162   :  { %470 = vmatprep.subr.bf16.mxu1 %v1954_v60 }
 0x163   :  { %430 = vmatpush1.bf16.msra.mxu0 %v1957_v61 }
 0x164   :  { %431 = vmatprep.subr.bf16.mxu0 %v1959_v62 }
 0x165   :  { %471 = vmatpush1.bf16.msra.mxu1 %v1963_v63 }
 0x166   :  { %472 = vmatprep.subr.bf16.mxu1 %v1966_v0 }
 0x167   :  { %432 = vmatpush1.bf16.msra.mxu0 %v1969_v1 }
 0x168   :  { %547 = vmatprep.subr.bf16.mxu0 %v1881_v35 }
 0x169   :  { %473 = vmatpush1.bf16.msra.mxu1 %v1973_v2 }
 0x16a   :  { %588 = vmatprep.subr.bf16.mxu1 %v1889_v38 }
 0x21d   :  { %v340_v3 = vpop.f32.mrb[0].mxu0 }
 0x21e   :  { %v388_v4 = vadd.f32 %v340_v3, %v1871_v20  ;;  %v342_v6 = vpop.f32.mrb[1].mxu0 }
 0x21f   :  { %v389_v7 = vadd.f32 %v342_v6, %v1873_v23  ;;  %v344_v8 = vpop.f32.mrb[2].mxu0  ;;  %v381_v9 = vpop.f32.mrb[8].mxu1 }
 0x220   :  { %v1439_v10 = vmul.f32 -1.442695, %v388_v4  ;;  %v345_v11 = vpop.f32.mrb[3].mxu0  ;;  %v383_v12 = vpop.f32.mrb[9].mxu1  ;;  %v390_v16 = vadd.f32 %v381_v9, %v1875_v30 }
 0x221   :  { %v1440_v13 = vmul.f32 -1.442695, %v389_v7  ;;  %v385_v14 = vpop.f32.mrb[10].mxu1  ;;  %v391_v18 = vadd.f32 %v383_v12, %v1877_v32 }
 0x222   :  { %1515 = vpow2.f32 %v1439_v10  ;;  %v386_v15 = vpop.f32.mrb[11].mxu1  ;;  %v1441_v17 = vmul.f32 -1.442695, %v390_v16 }
 0x223   :  { %1517 = vpow2.f32 %v1440_v13 }
 0x224   :  { %1519 = vpow2.f32 %v1441_v17 }
 0x225   :  { %1521 = vtanh.f32 %v391_v18 }
 0x22c   :  { %v1516_v19 = vpop.eup %1515 }
 0x22d   :  { %v1518_v21 = vpop.eup %1517  ;;  %v401_v22 = vadd.f32 1.0, %v1516_v19 }
 0x22e   :  { %v402_v24 = vadd.f32 1.0, %v1518_v21  ;;  %v1520_v25 = vpop.eup %1519 }
 0x22f   :  { %1523 = vrcp.f32 %v401_v22  ;;  %v1522_v26 = vpop.eup %1521  ;;  %v403_v28 = vadd.f32 1.0, %v1520_v25 }
 0x230   :  { %1525 = vrcp.f32 %v402_v24 }
 0x231   :  { %1527 = vrcp.f32 %v403_v28 }
 0x239   :  { %v1524_v27 = vpop.eup %1523 }
 0x23a   :  { %v1526_v29 = vpop.eup %1525  ;;  %v412_v31 = vmul.f32 %v1524_v27, %v1522_v26 }
 0x23b   :  { %v411_v33 = vmul.f32 0.0, %v1526_v29  ;;  %v1528_v3 = vpop.eup %1527 }
 0x23d   :  { %v2019_v34 = vadd.f32 %v412_v31, %v411_v33 }
 0x23f   :  { %1529 = vtanh.f32 %v2019_v34 }
 0x249   :  { %v1530_v4 = vpop.eup %1529 }
 0x24a   :  { %v415_v6 = vmul.f32 %v1530_v4, %v1528_v3 }
 0x24c   :  { %v416_v7 = vpack.c.bf16 %v415_v6, %v415_v6 }
 0x24e   :  { %450 = vmatmul.mubr.bf16.vlgmr.msra.gmra.mrb[4].mxu0 %v416_v7  ;;  %491 = vmatmul.mubr.bf16.vlgmr.msra.gmra.mrb[12].mxu1 %v416_v7 }
 0x24f   :  { %548 = vmatpush1.bf16.msra.mxu0 %v1883_v36  ;;  %589 = vmatpush1.bf16.msra.mxu1 %v1895_v40 }
 0x250   :  { %549 = vmatprep.subr.bf16.mxu0 %v1885_v37  ;;  %590 = vmatprep.subr.bf16.mxu1 %v1897_v41 }
 0x251   :  { %579 = vmatprep.mubr.bf16.mxu0 %v1785_v5  ;;  %620 = vmatprep.mubr.bf16.mxu1 %v1785_v5 }
 0x253   :  { %550 = vmatpush1.bf16.msra.mxu0 %v1892_v39  ;;  %591 = vmatpush1.bf16.msra.mxu1 %v1903_v43 }
 0x254   :  { %551 = vmatprep.subr.bf16.mxu0 %v1899_v42  ;;  %592 = vmatprep.subr.bf16.mxu1 %v1906_v44 }
 0x257   :  { %552 = vmatpush1.bf16.msra.mxu0 %v1909_v45  ;;  %593 = vmatpush1.bf16.msra.mxu1 %v1915_v47 }
 0x258   :  { %553 = vmatprep.subr.bf16.mxu0 %v1911_v46  ;;  %594 = vmatprep.subr.bf16.mxu1 %v1918_v48 }
 0x25b   :  { %554 = vmatpush1.bf16.msra.mxu0 %v1921_v49  ;;  %595 = vmatpush1.bf16.msra.mxu1 %v1927_v51 }
 0x25c   :  { %555 = vmatprep.subr.bf16.mxu0 %v1923_v50  ;;  %596 = vmatprep.subr.bf16.mxu1 %v1930_v52 }
 0x25f   :  { %556 = vmatpush1.bf16.msra.mxu0 %v1933_v53  ;;  %597 = vmatpush1.bf16.msra.mxu1 %v1939_v55 }
 0x260   :  { %557 = vmatprep.subr.bf16.mxu0 %v1935_v54  ;;  %598 = vmatprep.subr.bf16.mxu1 %v1942_v56 }
 0x263   :  { %558 = vmatpush1.bf16.msra.mxu0 %v1945_v57  ;;  %599 = vmatpush1.bf16.msra.mxu1 %v1951_v59 }
 0x264   :  { %559 = vmatprep.subr.bf16.mxu0 %v1947_v58  ;;  %600 = vmatprep.subr.bf16.mxu1 %v1954_v60 }
 0x267   :  { %560 = vmatpush1.bf16.msra.mxu0 %v1957_v61  ;;  %601 = vmatpush1.bf16.msra.mxu1 %v1963_v63 }
 0x268   :  { %561 = vmatprep.subr.bf16.mxu0 %v1959_v62  ;;  %602 = vmatprep.subr.bf16.mxu1 %v1966_v0 }
 0x26b   :  { %562 = vmatpush1.bf16.msra.mxu0 %v1969_v1  ;;  %603 = vmatpush1.bf16.msra.mxu1 %v1973_v2 }
 0x26c   :  { %676 = vmatprep.subr.bf16.mxu0 %v1881_v35  ;;  %717 = vmatprep.subr.bf16.mxu1 %v1889_v38 }
 0x321   :  { %v451_v8 = vpop.f32.mrb[4].mxu0  ;;  %v492_v9 = vpop.f32.mrb[12].mxu1 }
 0x322   :  { %v503_v10 = vrot.slane %v451_v8, 7  ;;  %v453_v11 = vpop.f32.mrb[5].mxu0  ;;  %v494_v12 = vpop.f32.mrb[13].mxu1  ;;  %v505_v24 = vrot.slane %v492_v9, 7  ;;  %v535_v8 = vrot.slane %v2019_v34, 7 }
 0x323   :  { %v504_v13 = vrot.slane %v453_v11, 7  ;;  %v455_v14 = vpop.f32.mrb[6].mxu0  ;;  %v496_v15 = vpop.f32.mrb[14].mxu1  ;;  %v506_v25 = vrot.slane %v494_v12, 7 }
 0x324   :  { %v511_v16 = vadd.f32 %v503_v10, %v1871_v20  ;;  %v456_v17 = vpop.f32.mrb[7].mxu0  ;;  %v497_v18 = vpop.f32.mrb[15].mxu1  ;;  %v513_v26 = vadd.f32 %v505_v24, %v1875_v30 }
 0x325   :  { %v512_v19 = vadd.f32 %v504_v13, %v1873_v23  ;;  %v514_v27 = vadd.f32 %v506_v25, %v1877_v32 }
 0x326   :  { %v1442_v21 = vmul.f32 -1.442695, %v511_v16  ;;  %v1444_v28 = vmul.f32 -1.442695, %v513_v26 }
 0x327   :  { %v1443_v22 = vmul.f32 -1.442695, %v512_v19 }
 0x328   :  { %1531 = vpow2.f32 %v1442_v21 }
 0x329   :  { %1533 = vpow2.f32 %v1443_v22 }
 0x32a   :  { %1535 = vtanh.f32 %v514_v27 }
 0x32b   :  { %1537 = vpow2.f32 %v1444_v28 }
 0x332   :  { %v1532_v29 = vpop.eup %1531 }
 0x333   :  { %v524_v31 = vadd.f32 1.0, %v1532_v29  ;;  %v1534_v33 = vpop.eup %1533 }
 0x334   :  { %v525_v3 = vadd.f32 1.0, %v1534_v33  ;;  %v1536_v4 = vpop.eup %1535 }
 0x335   :  { %1539 = vrcp.f32 %v524_v31  ;;  %v1538_v6 = vpop.eup %1537 }
 0x336   :  { %1541 = vrcp.f32 %v525_v3  ;;  %v526_v11 = vadd.f32 1.0, %v1538_v6 }
 0x338   :  { %1543 = vrcp.f32 %v526_v11 }
 0x33f   :  { %v1540_v7 = vpop.eup %1539 }
 0x340   :  { %v538_v9 = vmul.f32 %v1540_v7, %v1536_v4  ;;  %v1542_v10 = vpop.eup %1541 }
 0x341   :  { %v537_v12 = vmul.f32 %v1542_v10, %v535_v8 }
 0x342   :  { %v1544_v14 = vpop.eup %1543 }
 0x343   :  { %v2061_v13 = vadd.f32 %v538_v9, %v537_v12 }
 0x345   :  { %1545 = vtanh.f32 %v2061_v13 }
 0x34f   :  { %v1546_v15 = vpop.eup %1545 }
 0x350   :  { %v541_v16 = vmul.f32 %v1546_v15, %v1544_v14 }
 0x352   :  { %v542_v17 = vpack.c.bf16 %v541_v16, %v541_v16 }
 0x354   :  { %v544_v18 = vshrl.u32 %v542_v17, 16 }
 0x356   :  { %580 = vmatmul.mubr.bf16.vlgmr.msra.gmra.mrb[8].mxu0 %v544_v18  ;;  %621 = vmatmul.mubr.bf16.vlgmr.msra.gmra.mrb[16].mxu1 %v544_v18 }
 0x357   :  { %677 = vmatpush1.bf16.msra.mxu0 %v1883_v36  ;;  %718 = vmatpush1.bf16.msra.mxu1 %v1895_v40 }
 0x358   :  { %678 = vmatprep.subr.bf16.mxu0 %v1885_v37  ;;  %719 = vmatprep.subr.bf16.mxu1 %v1897_v41 }
 0x359   :  { %708 = vmatprep.mubr.bf16.mxu0 %v1785_v5  ;;  %749 = vmatprep.mubr.bf16.mxu1 %v1785_v5 }
 0x35b   :  { %679 = vmatpush1.bf16.msra.mxu0 %v1892_v39  ;;  %720 = vmatpush1.bf16.msra.mxu1 %v1903_v43 }
 0x35c   :  { %680 = vmatprep.subr.bf16.mxu0 %v1899_v42  ;;  %721 = vmatprep.subr.bf16.mxu1 %v1906_v44 }
 0x35f   :  { %681 = vmatpush1.bf16.msra.mxu0 %v1909_v45  ;;  %722 = vmatpush1.bf16.msra.mxu1 %v1915_v47 }
 0x360   :  { %682 = vmatprep.subr.bf16.mxu0 %v1911_v46  ;;  %723 = vmatprep.subr.bf16.mxu1 %v1918_v48 }
 0x363   :  { %683 = vmatpush1.bf16.msra.mxu0 %v1921_v49  ;;  %724 = vmatpush1.bf16.msra.mxu1 %v1927_v51 }
 0x364   :  { %684 = vmatprep.subr.bf16.mxu0 %v1923_v50  ;;  %725 = vmatprep.subr.bf16.mxu1 %v1930_v52 }
 0x367   :  { %685 = vmatpush1.bf16.msra.mxu0 %v1933_v53  ;;  %726 = vmatpush1.bf16.msra.mxu1 %v1939_v55 }
 0x368   :  { %686 = vmatprep.subr.bf16.mxu0 %v1935_v54  ;;  %727 = vmatprep.subr.bf16.mxu1 %v1942_v56 }
 0x36b   :  { %687 = vmatpush1.bf16.msra.mxu0 %v1945_v57  ;;  %728 = vmatpush1.bf16.msra.mxu1 %v1951_v59 }
 0x36c   :  { %688 = vmatprep.subr.bf16.mxu0 %v1947_v58  ;;  %729 = vmatprep.subr.bf16.mxu1 %v1954_v60 }
 0x36f   :  { %689 = vmatpush1.bf16.msra.mxu0 %v1957_v61  ;;  %730 = vmatpush1.bf16.msra.mxu1 %v1963_v63 }
 0x370   :  { %690 = vmatprep.subr.bf16.mxu0 %v1959_v62  ;;  %731 = vmatprep.subr.bf16.mxu1 %v1966_v0 }
 0x373   :  { %691 = vmatpush1.bf16.msra.mxu0 %v1969_v1  ;;  %732 = vmatpush1.bf16.msra.mxu1 %v1973_v2 }
 0x374   :  { %807 = vmatprep.subr.bf16.mxu0 %v1881_v35  ;;  %848 = vmatprep.subr.bf16.mxu1 %v1889_v38 }
 0x429   :  { %v581_v34 = vpop.f32.mrb[8].mxu0  ;;  %v622_v19 = vpop.f32.mrb[16].mxu1 }
 0x42a   :  { %v633_v21 = vrot.slane %v581_v34, 6  ;;  %v583_v22 = vpop.f32.mrb[9].mxu0  ;;  %v624_v24 = vpop.f32.mrb[17].mxu1  ;;  %v635_v6 = vrot.slane %v622_v19, 6  ;;  %v665_v34 = vrot.slane %v2061_v13, 7 }
 0x42b   :  { %v634_v25 = vrot.slane %v583_v22, 6  ;;  %v585_v26 = vpop.f32.mrb[10].mxu0  ;;  %v626_v27 = vpop.f32.mrb[18].mxu1  ;;  %v636_v7 = vrot.slane %v624_v24, 6 }
 0x42c   :  { %v641_v28 = vadd.f32 %v633_v21, %v1871_v20  ;;  %v586_v29 = vpop.f32.mrb[11].mxu0  ;;  %v627_v31 = vpop.f32.mrb[19].mxu1  ;;  %v643_v8 = vadd.f32 %v635_v6, %v1875_v30 }
 0x42d   :  { %v642_v33 = vadd.f32 %v634_v25, %v1873_v23  ;;  %v644_v9 = vadd.f32 %v636_v7, %v1877_v32 }
 0x42e   :  { %v1445_v3 = vmul.f32 -1.442695, %v641_v28  ;;  %v1447_v10 = vmul.f32 -1.442695, %v643_v8 }
 0x42f   :  { %v1446_v4 = vmul.f32 -1.442695, %v642_v33 }
 0x430   :  { %1547 = vpow2.f32 %v1445_v3 }
 0x431   :  { %1549 = vpow2.f32 %v1446_v4 }
 0x432   :  { %1551 = vtanh.f32 %v644_v9 }
 0x433   :  { %1553 = vpow2.f32 %v1447_v10 }
 0x43a   :  { %v1548_v11 = vpop.eup %1547 }
 0x43b   :  { %v654_v12 = vadd.f32 1.0, %v1548_v11  ;;  %v1550_v14 = vpop.eup %1549 }
 0x43c   :  { %v655_v15 = vadd.f32 1.0, %v1550_v14  ;;  %v1552_v16 = vpop.eup %1551 }
 0x43d   :  { %1555 = vrcp.f32 %v654_v12  ;;  %v1554_v17 = vpop.eup %1553 }
 0x43e   :  { %1557 = vrcp.f32 %v655_v15  ;;  %v656_v22 = vadd.f32 1.0, %v1554_v17 }
 0x440   :  { %1559 = vrcp.f32 %v656_v22 }
 0x447   :  { %v1556_v18 = vpop.eup %1555 }
 0x448   :  { %v668_v19 = vmul.f32 %v1556_v18, %v1552_v16  ;;  %v1558_v21 = vpop.eup %1557 }
 0x449   :  { %v667_v24 = vmul.f32 %v1558_v21, %v665_v34 }
 0x44a   :  { %v1560_v26 = vpop.eup %1559 }
 0x44b   :  { %v2103_v25 = vadd.f32 %v668_v19, %v667_v24 }
 0x44d   :  { %1561 = vtanh.f32 %v2103_v25 }
 0x457   :  { %v1562_v27 = vpop.eup %1561 }
 0x458   :  { %v671_v28 = vmul.f32 %v1562_v27, %v1560_v26 }
 0x45a   :  { %v672_v29 = vpack.c.bf16 %v671_v28, %v671_v28 }
 0x45c   :  { %v674_v31 = vrot.slane %v672_v29, 1 }
 0x45e   :  { %709 = vmatmul.mubr.bf16.vlgmr.msra.gmra.mrb[12].mxu0 %v674_v31  ;;  %750 = vmatmul.mubr.bf16.vlgmr.msra.gmra.mrb[20].mxu1 %v674_v31 }
 0x45f   :  { %808 = vmatpush1.bf16.msra.mxu0 %v1883_v36  ;;  %849 = vmatpush1.bf16.msra.mxu1 %v1895_v40 }
 0x460   :  { %809 = vmatprep.subr.bf16.mxu0 %v1885_v37  ;;  %850 = vmatprep.subr.bf16.mxu1 %v1897_v41 }
 0x461   :  { %839 = vmatprep.mubr.bf16.mxu0 %v1785_v5  ;;  %880 = vmatprep.mubr.bf16.mxu1 %v1785_v5 }
 0x463   :  { %810 = vmatpush1.bf16.msra.mxu0 %v1892_v39  ;;  %851 = vmatpush1.bf16.msra.mxu1 %v1903_v43 }
 0x464   :  { %811 = vmatprep.subr.bf16.mxu0 %v1899_v42  ;;  %852 = vmatprep.subr.bf16.mxu1 %v1906_v44 }
 0x467   :  { %812 = vmatpush1.bf16.msra.mxu0 %v1909_v45  ;;  %853 = vmatpush1.bf16.msra.mxu1 %v1915_v47 }
 0x468   :  { %813 = vmatprep.subr.bf16.mxu0 %v1911_v46  ;;  %854 = vmatprep.subr.bf16.mxu1 %v1918_v48 }
 0x46b   :  { %814 = vmatpush1.bf16.msra.mxu0 %v1921_v49  ;;  %855 = vmatpush1.bf16.msra.mxu1 %v1927_v51 }
 0x46c   :  { %815 = vmatprep.subr.bf16.mxu0 %v1923_v50  ;;  %856 = vmatprep.subr.bf16.mxu1 %v1930_v52 }
 0x46f   :  { %816 = vmatpush1.bf16.msra.mxu0 %v1933_v53  ;;  %857 = vmatpush1.bf16.msra.mxu1 %v1939_v55 }
 0x470   :  { %817 = vmatprep.subr.bf16.mxu0 %v1935_v54  ;;  %858 = vmatprep.subr.bf16.mxu1 %v1942_v56 }
 0x473   :  { %818 = vmatpush1.bf16.msra.mxu0 %v1945_v57  ;;  %859 = vmatpush1.bf16.msra.mxu1 %v1951_v59 }
 0x474   :  { %819 = vmatprep.subr.bf16.mxu0 %v1947_v58  ;;  %860 = vmatprep.subr.bf16.mxu1 %v1954_v60 }
 0x477   :  { %820 = vmatpush1.bf16.msra.mxu0 %v1957_v61  ;;  %861 = vmatpush1.bf16.msra.mxu1 %v1963_v63 }
 0x478   :  { %821 = vmatprep.subr.bf16.mxu0 %v1959_v62  ;;  %862 = vmatprep.subr.bf16.mxu1 %v1966_v0 }
 0x47b   :  { %822 = vmatpush1.bf16.msra.mxu0 %v1969_v1  ;;  %863 = vmatpush1.bf16.msra.mxu1 %v1973_v2 }
 0x47c   :  { %936 = vmatprep.subr.bf16.mxu0 %v1881_v35  ;;  %977 = vmatprep.subr.bf16.mxu1 %v1889_v38 }
 0x531   :  { %v710_v13 = vpop.f32.mrb[12].mxu0  ;;  %v751_v33 = vpop.f32.mrb[20].mxu1 }
 0x532   :  { %v762_v3 = vrot.slane %v710_v13, 5  ;;  %v712_v4 = vpop.f32.mrb[13].mxu0  ;;  %v753_v6 = vpop.f32.mrb[21].mxu1  ;;  %v764_v17 = vrot.slane %v751_v33, 5  ;;  %v794_v13 = vrot.slane %v2103_v25, 7 }
 0x533   :  { %v763_v7 = vrot.slane %v712_v4, 5  ;;  %v714_v8 = vpop.f32.mrb[14].mxu0  ;;  %v755_v9 = vpop.f32.mrb[22].mxu1  ;;  %v765_v18 = vrot.slane %v753_v6, 5 }
 0x534   :  { %v770_v10 = vadd.f32 %v762_v3, %v1871_v20  ;;  %v715_v11 = vpop.f32.mrb[15].mxu0  ;;  %v756_v12 = vpop.f32.mrb[23].mxu1  ;;  %v772_v34 = vadd.f32 %v764_v17, %v1875_v30 }
 0x535   :  { %v771_v14 = vadd.f32 %v763_v7, %v1873_v23  ;;  %v773_v19 = vadd.f32 %v765_v18, %v1877_v32 }
 0x536   :  { %v1448_v15 = vmul.f32 -1.442695, %v770_v10  ;;  %v1450_v21 = vmul.f32 -1.442695, %v772_v34 }
 0x537   :  { %v1449_v16 = vmul.f32 -1.442695, %v771_v14 }
 0x538   :  { %1563 = vpow2.f32 %v1448_v15 }
 0x539   :  { %1565 = vpow2.f32 %v1449_v16 }
 0x53a   :  { %1567 = vtanh.f32 %v773_v19 }
 0x53b   :  { %1569 = vpow2.f32 %v1450_v21 }
 0x542   :  { %v1564_v22 = vpop.eup %1563 }
 0x543   :  { %v783_v24 = vadd.f32 1.0, %v1564_v22  ;;  %v1566_v26 = vpop.eup %1565 }
 0x544   :  { %v784_v27 = vadd.f32 1.0, %v1566_v26  ;;  %v1568_v28 = vpop.eup %1567 }
 0x545   :  { %1571 = vrcp.f32 %v783_v24  ;;  %v1570_v29 = vpop.eup %1569 }
 0x546   :  { %1573 = vrcp.f32 %v784_v27  ;;  %v785_v4 = vadd.f32 1.0, %v1570_v29 }
 0x548   :  { %1575 = vrcp.f32 %v785_v4 }
 0x54f   :  { %v1572_v31 = vpop.eup %1571 }
 0x550   :  { %v797_v33 = vmul.f32 %v1572_v31, %v1568_v28  ;;  %v1574_v3 = vpop.eup %1573 }
 0x551   :  { %v796_v6 = vmul.f32 %v1574_v3, %v794_v13 }
 0x552   :  { %v1576_v8 = vpop.eup %1575 }
 0x553   :  { %v2145_v7 = vadd.f32 %v797_v33, %v796_v6 }
 0x555   :  { %1577 = vtanh.f32 %v2145_v7 }
 0x55f   :  { %v1578_v9 = vpop.eup %1577 }
 0x560   :  { %v800_v10 = vmul.f32 %v1578_v9, %v1576_v8 }
 0x562   :  { %v801_v11 = vpack.c.bf16 %v800_v10, %v800_v10 }
 0x564   :  { %v803_v12 = vshrl.u32 %v801_v11, 16 }
 0x566   :  { %v805_v14 = vrot.slane %v803_v12, 1 }
 0x568   :  { %840 = vmatmul.mubr.bf16.vlgmr.msra.gmra.mrb[16].mxu0 %v805_v14  ;;  %881 = vmatmul.mubr.bf16.vlgmr.msra.gmra.mrb[24].mxu1 %v805_v14 }
 0x569   :  { %937 = vmatpush1.bf16.msra.mxu0 %v1883_v36  ;;  %978 = vmatpush1.bf16.msra.mxu1 %v1895_v40 }
 0x56a   :  { %938 = vmatprep.subr.bf16.mxu0 %v1885_v37  ;;  %979 = vmatprep.subr.bf16.mxu1 %v1897_v41 }
 0x56b   :  { %968 = vmatprep.mubr.bf16.mxu0 %v1785_v5  ;;  %1009 = vmatprep.mubr.bf16.mxu1 %v1785_v5 }
 0x56d   :  { %939 = vmatpush1.bf16.msra.mxu0 %v1892_v39  ;;  %980 = vmatpush1.bf16.msra.mxu1 %v1903_v43 }
 0x56e   :  { %940 = vmatprep.subr.bf16.mxu0 %v1899_v42  ;;  %981 = vmatprep.subr.bf16.mxu1 %v1906_v44 }
 0x571   :  { %941 = vmatpush1.bf16.msra.mxu0 %v1909_v45  ;;  %982 = vmatpush1.bf16.msra.mxu1 %v1915_v47 }
 0x572   :  { %942 = vmatprep.subr.bf16.mxu0 %v1911_v46  ;;  %983 = vmatprep.subr.bf16.mxu1 %v1918_v48 }
 0x575   :  { %943 = vmatpush1.bf16.msra.mxu0 %v1921_v49  ;;  %984 = vmatpush1.bf16.msra.mxu1 %v1927_v51 }
 0x576   :  { %944 = vmatprep.subr.bf16.mxu0 %v1923_v50  ;;  %985 = vmatprep.subr.bf16.mxu1 %v1930_v52 }
 0x579   :  { %945 = vmatpush1.bf16.msra.mxu0 %v1933_v53  ;;  %986 = vmatpush1.bf16.msra.mxu1 %v1939_v55 }
 0x57a   :  { %946 = vmatprep.subr.bf16.mxu0 %v1935_v54  ;;  %987 = vmatprep.subr.bf16.mxu1 %v1942_v56 }
 0x57d   :  { %947 = vmatpush1.bf16.msra.mxu0 %v1945_v57  ;;  %988 = vmatpush1.bf16.msra.mxu1 %v1951_v59 }
 0x57e   :  { %948 = vmatprep.subr.bf16.mxu0 %v1947_v58  ;;  %989 = vmatprep.subr.bf16.mxu1 %v1954_v60 }
 0x581   :  { %949 = vmatpush1.bf16.msra.mxu0 %v1957_v61  ;;  %990 = vmatpush1.bf16.msra.mxu1 %v1963_v63 }
 0x582   :  { %950 = vmatprep.subr.bf16.mxu0 %v1959_v62  ;;  %991 = vmatprep.subr.bf16.mxu1 %v1966_v0 }
 0x585   :  { %951 = vmatpush1.bf16.msra.mxu0 %v1969_v1  ;;  %992 = vmatpush1.bf16.msra.mxu1 %v1973_v2 }
 0x586   :  { %1067 = vmatprep.subr.bf16.mxu0 %v1881_v35  ;;  %1108 = vmatprep.subr.bf16.mxu1 %v1889_v38 }
 0x63b   :  { %v841_v25 = vpop.f32.mrb[16].mxu0  ;;  %v882_v15 = vpop.f32.mrb[24].mxu1 }
 0x63c   :  { %v893_v16 = vrot.slane %v841_v25, 4  ;;  %v843_v17 = vpop.f32.mrb[17].mxu0  ;;  %v884_v18 = vpop.f32.mrb[25].mxu1  ;;  %v895_v31 = vrot.slane %v882_v15, 4  ;;  %v925_v25 = vrot.slane %v2145_v7, 7 }
 0x63d   :  { %v894_v34 = vrot.slane %v843_v17, 4  ;;  %v845_v19 = vpop.f32.mrb[18].mxu0  ;;  %v886_v21 = vpop.f32.mrb[26].mxu1  ;;  %v896_v13 = vrot.slane %v884_v18, 4 }
 0x63e   :  { %v901_v22 = vadd.f32 %v893_v16, %v1871_v20  ;;  %v846_v24 = vpop.f32.mrb[19].mxu0  ;;  %v887_v26 = vpop.f32.mrb[27].mxu1  ;;  %v903_v33 = vadd.f32 %v895_v31, %v1875_v30 }
 0x63f   :  { %v902_v27 = vadd.f32 %v894_v34, %v1873_v23  ;;  %v904_v3 = vadd.f32 %v896_v13, %v1877_v32 }
 0x640   :  { %v1451_v28 = vmul.f32 -1.442695, %v901_v22  ;;  %v1453_v4 = vmul.f32 -1.442695, %v903_v33  ;;  %v1643_v33 = vld [vmem:[#allocation2] sm:$0xff] }
 0x641   :  { %v1452_v29 = vmul.f32 -1.442695, %v902_v27 }
 0x642   :  { %1579 = vpow2.f32 %v1451_v28 }
 0x643   :  { %1581 = vpow2.f32 %v1452_v29 }
 0x644   :  { %1583 = vtanh.f32 %v904_v3  ;;  %v1644_v3 = vld [vmem:[#allocation2 + $0x10] sm:$0xff] }
 0x645   :  { %1585 = vpow2.f32 %v1453_v4  ;;  %v1645_v4 = vld [vmem:[#allocation2 + $0x28] sm:$0xff] }
 0x64c   :  { %v1580_v6 = vpop.eup %1579 }
 0x64d   :  { %v914_v8 = vadd.f32 1.0, %v1580_v6  ;;  %v1582_v9 = vpop.eup %1581  ;;  %v1646_v6 = vld [vmem:[#allocation2 + $0x38] sm:$0xff] }
 0x64e   :  { %v915_v10 = vadd.f32 1.0, %v1582_v9  ;;  %v1584_v11 = vpop.eup %1583  ;;  %v1648_v9 = vld [vmem:[#allocation2 + $0x30] sm:$0xff] }
 0x64f   :  { %1587 = vrcp.f32 %v914_v8  ;;  %v1586_v12 = vpop.eup %1585  ;;  %v1647_v8 = vld [vmem:[#allocation2 + $0x20] sm:$0xff] }
 0x650   :  { %1589 = vrcp.f32 %v915_v10  ;;  %v916_v17 = vadd.f32 1.0, %v1586_v12  ;;  %v1649_v10 = vld [vmem:[#allocation2 + $0x48] sm:$0xff]  ;;  %v1651_v12 = vld [vmem:[#allocation2 + $0x40] sm:$0xff] }
 0x652   :  { %1591 = vrcp.f32 %v916_v17  ;;  %v1656_v17 = vld [vmem:[#allocation2 + $0x70] sm:$0xff] }
 0x659   :  { %v1588_v14 = vpop.eup %1587 }
 0x65a   :  { %v928_v15 = vmul.f32 %v1588_v14, %v1584_v11  ;;  %v1590_v16 = vpop.eup %1589  ;;  %v1650_v11 = vld [vmem:[#allocation2 + $0x58] sm:$0xff]  ;;  %v1652_v14 = vld [vmem:[#allocation2 + $0x50] sm:$0xff] }
 0x65b   :  { %v927_v18 = vmul.f32 %v1590_v16, %v925_v25  ;;  %v1653_v25 = vld [vmem:[#allocation2 + $0x68] sm:$0xff]  ;;  %v1655_v16 = vld [vmem:[#allocation2 + $0x60] sm:$0xff] }
 0x65c   :  { %v1592_v19 = vpop.eup %1591 }
 0x65d   :  { %v2187_v34 = vadd.f32 %v928_v15, %v927_v18  ;;  %v1654_v15 = vld [vmem:[#allocation2 + $0x78] sm:$0xff] }
 0x65e   :  { %v1658_v18 = vld [vmem:[#allocation2 + $0x98] sm:$0xff] }
 0x65f   :  { %1593 = vtanh.f32 %v2187_v34 }
 0x669   :  { %v1594_v21 = vpop.eup %1593 }
 0x66a   :  { %v931_v22 = vmul.f32 %v1594_v21, %v1592_v19  ;;  %v1660_v19 = vld [vmem:[#allocation2 + $0x90] sm:$0xff]  ;;  %v1661_v21 = vld [vmem:[#allocation2 + $0xa8] sm:$0xff] }
 0x66c   :  { %v932_v24 = vpack.c.bf16 %v931_v22, %v931_v22  ;;  %v1662_v22 = vld [vmem:[#allocation2 + $0xb8] sm:$0xff] }
 0x66e   :  { %v934_v26 = vrot.slane %v932_v24, 2  ;;  %v1663_v24 = vld [vmem:[#allocation2 + $0xa0] sm:$0xff] }
 0x670   :  { %969 = vmatmul.mubr.bf16.vlgmr.msra.gmra.mrb[20].mxu0 %v934_v26  ;;  %1010 = vmatmul.mubr.bf16.vlgmr.msra.gmra.mrb[28].mxu1 %v934_v26  ;;  %v1664_v26 = vld [vmem:[#allocation2 + $0xb0] sm:$0xff] }
 0x671   :  { %1068 = vmatpush1.bf16.msra.mxu0 %v1883_v36  ;;  %1109 = vmatpush1.bf16.msra.mxu1 %v1895_v40 }
 0x672   :  { %1069 = vmatprep.subr.bf16.mxu0 %v1885_v37  ;;  %1110 = vmatprep.subr.bf16.mxu1 %v1897_v41 }
 0x673   :  { %1099 = vmatprep.mubr.bf16.mxu0 %v1785_v5  ;;  %1140 = vmatprep.mubr.bf16.mxu1 %v1785_v5 }
 0x675   :  { %1070 = vmatpush1.bf16.msra.mxu0 %v1892_v39  ;;  %1111 = vmatpush1.bf16.msra.mxu1 %v1903_v43 }
 0x676   :  { %1071 = vmatprep.subr.bf16.mxu0 %v1899_v42  ;;  %1112 = vmatprep.subr.bf16.mxu1 %v1906_v44 }
 0x679   :  { %1072 = vmatpush1.bf16.msra.mxu0 %v1909_v45  ;;  %1113 = vmatpush1.bf16.msra.mxu1 %v1915_v47 }
 0x67a   :  { %1073 = vmatprep.subr.bf16.mxu0 %v1911_v46  ;;  %1114 = vmatprep.subr.bf16.mxu1 %v1918_v48 }
 0x67d   :  { %1074 = vmatpush1.bf16.msra.mxu0 %v1921_v49  ;;  %1115 = vmatpush1.bf16.msra.mxu1 %v1927_v51 }
 0x67e   :  { %1075 = vmatprep.subr.bf16.mxu0 %v1923_v50  ;;  %1116 = vmatprep.subr.bf16.mxu1 %v1930_v52 }
 0x681   :  { %1076 = vmatpush1.bf16.msra.mxu0 %v1933_v53  ;;  %1117 = vmatpush1.bf16.msra.mxu1 %v1939_v55 }
 0x682   :  { %1077 = vmatprep.subr.bf16.mxu0 %v1935_v54  ;;  %1118 = vmatprep.subr.bf16.mxu1 %v1942_v56 }
 0x685   :  { %1078 = vmatpush1.bf16.msra.mxu0 %v1945_v57  ;;  %1119 = vmatpush1.bf16.msra.mxu1 %v1951_v59 }
 0x686   :  { %1079 = vmatprep.subr.bf16.mxu0 %v1947_v58  ;;  %1120 = vmatprep.subr.bf16.mxu1 %v1954_v60 }
 0x689   :  { %1080 = vmatpush1.bf16.msra.mxu0 %v1957_v61  ;;  %1121 = vmatpush1.bf16.msra.mxu1 %v1963_v63  ;;  %v1054_v61 = vrot.slane %v2187_v34, 7  ;;  %v1659_v34 = vld [vmem:[#allocation2 + $0x80] sm:$0xff] }
 0x68a   :  { %1081 = vmatprep.subr.bf16.mxu0 %v1959_v62  ;;  %1122 = vmatprep.subr.bf16.mxu1 %v1966_v0 }
 0x68d   :  { %1082 = vmatpush1.bf16.msra.mxu0 %v1969_v1  ;;  %1123 = vmatpush1.bf16.msra.mxu1 %v1973_v2 }
 0x68e   :  { %1196 = vmatprep.subr.bf16.mxu0 %v1881_v35  ;;  %1237 = vmatprep.subr.bf16.mxu1 %v1889_v38 }
 0x743   :  { %v970_v36 = vpop.f32.mrb[20].mxu0  ;;  %v1011_v37 = vpop.f32.mrb[28].mxu1 }
 0x744   :  { %v1022_v39 = vrot.slane %v970_v36, 3  ;;  %v972_v40 = vpop.f32.mrb[21].mxu0  ;;  %v1013_v41 = vpop.f32.mrb[29].mxu1  ;;  %v1024_v35 = vrot.slane %v1011_v37, 3  ;;  %v1665_v36 = vld [vmem:[#allocation2 + $0xc8] sm:$0xff]  ;;  %v1666_v37 = vld [vmem:[#allocation2 + $0xd8] sm:$0xff] }
 0x745   :  { %v1023_v42 = vrot.slane %v972_v40, 3  ;;  %v974_v43 = vpop.f32.mrb[22].mxu0  ;;  %v1015_v44 = vpop.f32.mrb[30].mxu1  ;;  %v1025_v38 = vrot.slane %v1013_v41, 3  ;;  %v1668_v40 = vld [vmem:[#allocation2 + $0xd0] sm:$0xff]  ;;  %v1669_v41 = vld [vmem:[#allocation2 + $0xe8] sm:$0xff] }
 0x746   :  { %v1030_v45 = vadd.f32 %v1022_v39, %v1871_v20  ;;  %v975_v46 = vpop.f32.mrb[23].mxu0  ;;  %v1016_v47 = vpop.f32.mrb[31].mxu1  ;;  %v1032_v51 = vadd.f32 %v1024_v35, %v1875_v30  ;;  %v1667_v39 = vld [vmem:[#allocation2 + $0xc0] sm:$0xff]  ;;  %v1672_v44 = vld [vmem:[#allocation2 + $0xf0] sm:$0xff] }
 0x747   :  { %v1031_v48 = vadd.f32 %v1023_v42, %v1873_v23  ;;  %v1033_v52 = vadd.f32 %v1025_v38, %v1877_v32  ;;  %v1670_v42 = vld [vmem:[#allocation2 + $0xf8] sm:$0xff]  ;;  %v1671_v43 = vld [vmem:[#allocation2 + $0xe0] sm:$0xff] }
 0x748   :  { %v1454_v49 = vmul.f32 -1.442695, %v1030_v45  ;;  %v1456_v53 = vmul.f32 -1.442695, %v1032_v51 }
 0x749   :  { %v1455_v50 = vmul.f32 -1.442695, %v1031_v48 }
 0x74a   :  { %1595 = vpow2.f32 %v1454_v49 }
 0x74b   :  { %1597 = vpow2.f32 %v1455_v50 }
 0x74c   :  { %1599 = vtanh.f32 %v1033_v52 }
 0x74d   :  { %1601 = vpow2.f32 %v1456_v53 }
 0x754   :  { %v1596_v54 = vpop.eup %1595 }
 0x755   :  { %v1043_v55 = vadd.f32 1.0, %v1596_v54  ;;  %v1598_v56 = vpop.eup %1597 }
 0x756   :  { %v1044_v57 = vadd.f32 1.0, %v1598_v56  ;;  %v1600_v58 = vpop.eup %1599 }
 0x757   :  { %1603 = vrcp.f32 %v1043_v55  ;;  %v1602_v59 = vpop.eup %1601 }
 0x758   :  { %1605 = vrcp.f32 %v1044_v57  ;;  %v1045_v0 = vadd.f32 1.0, %v1602_v59 }
 0x75a   :  { %1607 = vrcp.f32 %v1045_v0 }
 0x761   :  { %v1604_v60 = vpop.eup %1603 }
 0x762   :  { %v1057_v62 = vmul.f32 %v1604_v60, %v1600_v58  ;;  %v1606_v63 = vpop.eup %1605 }
 0x763   :  { %v1056_v1 = vmul.f32 %v1606_v63, %v1054_v61 }
 0x764   :  { %v1608_v7 = vpop.eup %1607 }
 0x765   :  { %v2229_v2 = vadd.f32 %v1057_v62, %v1056_v1 }
 0x767   :  { %1609 = vtanh.f32 %v2229_v2 }
 0x771   :  { %v1610_v27 = vpop.eup %1609 }
 0x772   :  { %v1060_v28 = vmul.f32 %v1610_v27, %v1608_v7 }
 0x774   :  { %v1061_v29 = vpack.c.bf16 %v1060_v28, %v1060_v28 }
 0x776   :  { %v1063_v31 = vshrl.u32 %v1061_v29, 16  ;;  %v1185_v29 = vrot.slane %v2229_v2, 7 }
 0x778   :  { %v1065_v13 = vrot.slane %v1063_v31, 2 }
 0x77a   :  { %1100 = vmatmul.mubr.bf16.vlgmr.msra.gmra.mrb[24].mxu0 %v1065_v13  ;;  %1141 = vmatmul.mubr.bf16.vlgmr.msra.gmra.mrb[32].mxu1 %v1065_v13 }
 0x77b   :  { %1197 = vmatpush1.bf16.msra.mxu0 %v1643_v33  ;;  %1238 = vmatpush1.bf16.msra.mxu1 %v1644_v3 }
 0x77c   :  { %1198 = vmatprep.subr.bf16.mxu0 %v1645_v4  ;;  %1239 = vmatprep.subr.bf16.mxu1 %v1646_v6 }
 0x77d   :  { %1228 = vmatprep.mubr.bf16.mxu0 %v1785_v5  ;;  %1269 = vmatprep.mubr.bf16.mxu1 %v1785_v5  ;;  %v1657_v5 = vld [vmem:[#allocation2 + $0x88] sm:$0xff] }
 0x77f   :  { %1199 = vmatpush1.bf16.msra.mxu0 %v1647_v8  ;;  %1240 = vmatpush1.bf16.msra.mxu1 %v1648_v9 }
 0x780   :  { %1200 = vmatprep.subr.bf16.mxu0 %v1649_v10  ;;  %1241 = vmatprep.subr.bf16.mxu1 %v1650_v11 }
 0x783   :  { %1201 = vmatpush1.bf16.msra.mxu0 %v1651_v12  ;;  %1242 = vmatpush1.bf16.msra.mxu1 %v1652_v14 }
 0x784   :  { %1202 = vmatprep.subr.bf16.mxu0 %v1653_v25  ;;  %1243 = vmatprep.subr.bf16.mxu1 %v1654_v15 }
 0x787   :  { %1203 = vmatpush1.bf16.msra.mxu0 %v1655_v16  ;;  %1244 = vmatpush1.bf16.msra.mxu1 %v1656_v17 }
 0x788   :  { %1204 = vmatprep.subr.bf16.mxu0 %v1657_v5  ;;  %1245 = vmatprep.subr.bf16.mxu1 %v1658_v18 }
 0x78b   :  { %1205 = vmatpush1.bf16.msra.mxu0 %v1659_v34  ;;  %1246 = vmatpush1.bf16.msra.mxu1 %v1660_v19 }
 0x78c   :  { %1206 = vmatprep.subr.bf16.mxu0 %v1661_v21  ;;  %1247 = vmatprep.subr.bf16.mxu1 %v1662_v22 }
 0x78f   :  { %1207 = vmatpush1.bf16.msra.mxu0 %v1663_v24  ;;  %1248 = vmatpush1.bf16.msra.mxu1 %v1664_v26 }
 0x790   :  { %1208 = vmatprep.subr.bf16.mxu0 %v1665_v36  ;;  %1249 = vmatprep.subr.bf16.mxu1 %v1666_v37 }
 0x793   :  { %1209 = vmatpush1.bf16.msra.mxu0 %v1667_v39  ;;  %1250 = vmatpush1.bf16.msra.mxu1 %v1668_v40 }
 0x794   :  { %1210 = vmatprep.subr.bf16.mxu0 %v1669_v41  ;;  %1251 = vmatprep.subr.bf16.mxu1 %v1670_v42 }
 0x797   :  { %1211 = vmatpush1.bf16.msra.mxu0 %v1671_v43  ;;  %1252 = vmatpush1.bf16.msra.mxu1 %v1672_v44 }
 0x84d   :  { %v1101_v45 = vpop.f32.mrb[24].mxu0  ;;  %v1142_v46 = vpop.f32.mrb[32].mxu1 }
 0x84e   :  { %v1153_v47 = vrot.slane %v1101_v45, 2  ;;  %v1103_v48 = vpop.f32.mrb[25].mxu0  ;;  %v1144_v49 = vpop.f32.mrb[33].mxu1  ;;  %v1155_v57 = vrot.slane %v1142_v46, 2 }
 0x84f   :  { %v1154_v50 = vrot.slane %v1103_v48, 2  ;;  %v1105_v35 = vpop.f32.mrb[26].mxu0  ;;  %v1146_v38 = vpop.f32.mrb[34].mxu1  ;;  %v1156_v58 = vrot.slane %v1144_v49, 2 }
 0x850   :  { %v1161_v51 = vadd.f32 %v1153_v47, %v1871_v20  ;;  %v1106_v52 = vpop.f32.mrb[27].mxu0  ;;  %v1147_v53 = vpop.f32.mrb[35].mxu1  ;;  %v1163_v59 = vadd.f32 %v1155_v57, %v1875_v30 }
 0x851   :  { %v1162_v54 = vadd.f32 %v1154_v50, %v1873_v23  ;;  %v1164_v60 = vadd.f32 %v1156_v58, %v1877_v32 }
 0x852   :  { %v1457_v55 = vmul.f32 -1.442695, %v1161_v51  ;;  %v1459_v61 = vmul.f32 -1.442695, %v1163_v59 }
 0x853   :  { %v1458_v56 = vmul.f32 -1.442695, %v1162_v54 }
 0x854   :  { %1611 = vpow2.f32 %v1457_v55 }
 0x855   :  { %1613 = vpow2.f32 %v1458_v56 }
 0x856   :  { %1615 = vtanh.f32 %v1164_v60 }
 0x857   :  { %1617 = vpow2.f32 %v1459_v61 }
 0x85e   :  { %v1612_v62 = vpop.eup %1611 }
 0x85f   :  { %v1174_v63 = vadd.f32 1.0, %v1612_v62  ;;  %v1614_v0 = vpop.eup %1613 }
 0x860   :  { %v1175_v1 = vadd.f32 1.0, %v1614_v0  ;;  %v1616_v7 = vpop.eup %1615 }
 0x861   :  { %1619 = vrcp.f32 %v1174_v63  ;;  %v1618_v27 = vpop.eup %1617 }
 0x862   :  { %1621 = vrcp.f32 %v1175_v1  ;;  %v1176_v33 = vadd.f32 1.0, %v1618_v27 }
 0x864   :  { %1623 = vrcp.f32 %v1176_v33 }
 0x86b   :  { %v1620_v28 = vpop.eup %1619 }
 0x86c   :  { %v1188_v31 = vmul.f32 %v1620_v28, %v1616_v7  ;;  %v1622_v13 = vpop.eup %1621 }
 0x86d   :  { %v1187_v3 = vmul.f32 %v1622_v13, %v1185_v29 }
 0x86e   :  { %v1624_v6 = vpop.eup %1623 }
 0x86f   :  { %v1189_v4 = vadd.f32 %v1188_v31, %v1187_v3 }
 0x871   :  { %1625 = vtanh.f32 %v1189_v4  ;;  %v1314_v46 = vrot.slane %v1189_v4, 7 }
 0x87b   :  { %v1626_v8 = vpop.eup %1625 }
 0x87c   :  { %v1191_v9 = vmul.f32 %v1626_v8, %v1624_v6 }
 0x87e   :  { %v1192_v10 = vpack.c.bf16 %v1191_v9, %v1191_v9 }
 0x880   :  { %v1194_v11 = vrot.slane %v1192_v10, 3 }
 0x882   :  { %1229 = vmatmul.mubr.bf16.vlgmr.msra.gmra.mrb[28].mxu0 %v1194_v11  ;;  %1270 = vmatmul.mubr.bf16.vlgmr.msra.gmra.mrb[36].mxu1 %v1194_v11 }
 0x955   :  { %v1230_v12 = vpop.f32.mrb[28].mxu0  ;;  %v1271_v14 = vpop.f32.mrb[36].mxu1 }
 0x956   :  { %v1282_v25 = vrot.slane %v1230_v12, 1  ;;  %v1232_v15 = vpop.f32.mrb[29].mxu0  ;;  %v1273_v16 = vpop.f32.mrb[37].mxu1  ;;  %v1284_v26 = vrot.slane %v1271_v14, 1 }
 0x957   :  { %v1283_v2 = vrot.slane %v1232_v15, 1  ;;  %v1234_v17 = vpop.f32.mrb[30].mxu0  ;;  %v1275_v5 = vpop.f32.mrb[38].mxu1  ;;  %v1285_v36 = vrot.slane %v1273_v16, 1 }
 0x958   :  { %v1290_v18 = vadd.f32 %v1282_v25, %v1871_v20  ;;  %v1235_v34 = vpop.f32.mrb[31].mxu0  ;;  %v1276_v19 = vpop.f32.mrb[39].mxu1  ;;  %v1292_v37 = vadd.f32 %v1284_v26, %v1875_v30 }
 0x959   :  { %v1291_v21 = vadd.f32 %v1283_v2, %v1873_v23  ;;  %v1293_v39 = vadd.f32 %v1285_v36, %v1877_v32 }
 0x95a   :  { %v1460_v22 = vmul.f32 -1.442695, %v1290_v18  ;;  %v1462_v40 = vmul.f32 -1.442695, %v1292_v37 }
 0x95b   :  { %v1461_v24 = vmul.f32 -1.442695, %v1291_v21 }
 0x95c   :  { %1627 = vpow2.f32 %v1460_v22 }
 0x95d   :  { %1629 = vpow2.f32 %v1461_v24 }
 0x95e   :  { %1631 = vtanh.f32 %v1293_v39 }
 0x95f   :  { %1633 = vpow2.f32 %v1462_v40 }
 0x966   :  { %v1628_v41 = vpop.eup %1627 }
 0x967   :  { %v1303_v42 = vadd.f32 1.0, %v1628_v41  ;;  %v1630_v43 = vpop.eup %1629 }
 0x968   :  { %v1304_v20 = vadd.f32 1.0, %v1630_v43  ;;  %v1632_v23 = vpop.eup %1631 }
 0x969   :  { %1635 = vrcp.f32 %v1303_v42  ;;  %v1634_v44 = vpop.eup %1633 }
 0x96a   :  { %1637 = vrcp.f32 %v1304_v20  ;;  %v1305_v49 = vadd.f32 1.0, %v1634_v44 }
 0x96c   :  { %1639 = vrcp.f32 %v1305_v49 }
 0x973   :  { %v1636_v45 = vpop.eup %1635 }
 0x974   :  { %v1317_v47 = vmul.f32 %v1636_v45, %v1632_v23  ;;  %v1638_v48 = vpop.eup %1637 }
 0x975   :  { %v1316_v50 = vmul.f32 %v1638_v48, %v1314_v46 }
 0x976   :  { %v1640_v32 = vpop.eup %1639 }
 0x977   :  { %v1318_v30 = vadd.f32 %v1317_v47, %v1316_v50 }
 0x979   :  { %1641 = vtanh.f32 %v1318_v30 }
 0x983   :  { %v1642_v35 = vpop.eup %1641 }
 0x984   :  { %v1320_v38 = vmul.f32 %v1642_v35, %v1640_v32 }
 0x985   :  { %1767 = dma.done.wait [#allocation5 + $0x1], 1024 }
 0x986   :  { %1768 = vsyncadd [#allocation5 + $0x1], 4294966272 }
 0x987   :  { %1769 = dma.done.wait [#allocation5 + $0x2], 16 }
 0x988   :  { %1770 = vsyncadd [#allocation5 + $0x2], 4294967280  ;;  %v1786_v51 = vmov 0.0   ;;  %vm1787_vm2 = vmmov 0   ;;  %v1328_v52 = vld [vmem:[#allocation3] sm:$0xff]  ;;  %v1329_v53 = vld [vmem:[#allocation3 + $0x8] sm:$0xff]  ;;  %v1327_v58 = vpack.c.bf16 %v1320_v38, %v1320_v38 }
 0x989   :  { %1475 = vmatprep.subr.bf16.mxu0 %v1786_v51  ;;  %1491 = vmatprep.mubr.msk.bf16.mxu0 %vm1787_vm2, %v1786_v51  ;;  %v1330_v54 = vld [vmem:[#allocation3 + $0x10] sm:$0xff]  ;;  %v1331_v55 = vld [vmem:[#allocation3 + $0x18] sm:$0xff]  ;;  %v1332_v56 = vld [vmem:[#allocation3 + $0x20] sm:$0xff]  ;;  %s1788_s2 = smov [#allocation11]  }
 0x98a   :  { %1476 = vmatpush3.bf16.msra.mxu0 %v1328_v52  ;;  %v1333_v57 = vld [vmem:[#allocation3 + $0x28] sm:$0xff]  ;;  %v1334_v59 = vld [vmem:[#allocation3 + $0x30] sm:$0xff]  ;;  %v1338_v60 = vshrl.u32 %v1327_v58, 16  ;;  %v1335_v61 = vld [vmem:[#allocation3 + $0x38] sm:$0xff]  ;;  %s1389_s22 = sshll.u32 %s1788_s2, 4  ;;  %s1390_s22 = int_to_ptr.vmem [resolvable:$true] %s1389_s22 }
 0x98b   :  { %1477 = vmatprep.subr.bf16.mxu0 %v1786_v51  ;;  %v1336_v63 = vld [vmem:[#allocation4] sm:$0x1]  ;;  %s1739_s23 = scalar_lea.vmem %s1390_s22, 16  ;;  %s1743_s25 = scalar_lea.vmem %s1390_s22, 32 }
 0x98c   :  { %v1340_v62 = vrot.slane %v1338_v60, 3  ;;  %p1740_p10 = scmp.ne.s32.totalorder %s1390_s22, %s1739_s23  ;;  %p1744_p11 = scmp.lt.s32.totalorder %s1390_s22, %s1390_s22 }
 0x98d   :  { %p1745_p12 = scmp.lt.s32.totalorder %s1743_s25, %s1739_s23 }
 0x98e   :  { %1478 = vmatpush3.bf16.msra.mxu0 %v1329_v53 }
 0x98f   :  { %1479 = vmatprep.subr.bf16.mxu0 %v1786_v51  ;;  %p1746_p13 = por %p1745_p12, %p1744_p11 }
 0x991   :  { %p1747_p0 = pnand %p1746_p13, %p1740_p10 }
 0x992   :  { %1480 = vmatpush3.bf16.msra.mxu0 %v1330_v54 }
 0x993   :  { %1481 = vmatprep.subr.bf16.mxu0 %v1786_v51 }
 0x996   :  { %1482 = vmatpush3.bf16.msra.mxu0 %v1331_v55 }
 0x997   :  { %1483 = vmatprep.subr.bf16.mxu0 %v1786_v51 }
 0x99a   :  { %1484 = vmatpush3.bf16.msra.mxu0 %v1332_v56 }
 0x99b   :  { %1485 = vmatprep.subr.bf16.mxu0 %v1786_v51 }
 0x99e   :  { %1486 = vmatpush3.bf16.msra.mxu0 %v1333_v57 }
 0x99f   :  { %1487 = vmatprep.subr.bf16.mxu0 %v1786_v51 }
 0x9a2   :  { %1488 = vmatpush3.bf16.msra.mxu0 %v1334_v59 }
 0x9a3   :  { %1489 = vmatprep.subr.bf16.mxu0 %v1786_v51 }
 0x9a6   :  { %1490 = vmatpush3.bf16.msra.mxu0 %v1335_v61 }
 0x9a9   :  { %1492 = vmatmul.mubr.bf16.vlgmr.msra.gmra.mrb[32].mxu0 %v1340_v62 }
 0xa7c   :  { %v1376_v0 = vpop.f32.mrb[32].mxu0 }
 0xa7d   :  { %v1377_v1 = vadd.f32 %v1376_v0, %v1336_v63  ;;  %v1493_v7 = vpop.f32.mrb[33].mxu0 }
 0xa7e   :  { %v1379_v27 = vpop.f32.mrb[34].mxu0 }
 0xa7f   :  { %1382 = vst [vmem:[#allocation11] sm:$0x1] %v1377_v1  ;;  %v1494_v28 = vpop.f32.mrb[35].mxu0 }
 0xa80   :  { %1750 = shalt.err (!%p1747_p0)
}
 0xa81   :  { %s1751_s28 = scalar_lea.hbm %s2261_s6, 16 }
 0xa82   :  { %p1752_p1 = scmp.ne.s32.totalorder %s2261_s6, %s1751_s28  ;;  %p1755_p2 = scmp.lt.u32.totalorder %s1751_s28, %s2261_s6 }
 0xa84   :  { %p1757_p3 = pnand %p1755_p2, %p1752_p1 }
 0xa86   :  { %1760 = shalt.err (!%p1757_p3)
}
 0xa87   :  { %1392 = dma.vmem_to_hbm [thread:$0]  %s1390_s22, 16, %s2261_s6, [#allocation8]  }
 0xa88   :  { %1771 = dma.done.wait [#allocation8], 16  }
 0xa89   :  { %1772 = vsyncadd [#allocation8], 4294967280 }
 0xa8a   :  { %1396 = vsyncpa [#allocation7], 1 }
 0xa8b   :  { %1397 = vsyncpa [#allocation10], 1 }
 0xa8c   :  { %1398 = vsyncpa [#allocation8], 1 }
 0xa8d   :  { %1399 = vsyncmov [#allocation5] }
 0xa90   :  { %s1400_s9 = vpop.sfrf %1399 }
 0xa91   :  { %p1463_p4 = scmp.ne.s32.totalorder %s1400_s9, 0 }
 0xa93   :  { %1404 = shalt.err (%p1463_p4)  }
 0xa94   :  { %1406 = vsyncmov [#allocation5 + $0x1] }
 0xa97   :  { %s1407_s10 = vpop.sfrf %1406 }
 0xa98   :  { %p1464_p5 = scmp.ne.s32.totalorder %s1407_s10, 0 }
 0xa9a   :  { %1411 = shalt.err (%p1464_p5)  }
 0xa9b   :  { %1413 = vsyncmov [#allocation5 + $0x2] }
 0xa9e   :  { %s1414_s11 = vpop.sfrf %1413 }
 0xa9f   :  { %p1465_p6 = scmp.ne.s32.totalorder %s1414_s11, 0 }
 0xaa1   :  { %1418 = shalt.err (%p1465_p6)  }

</bundles_post_ra>
